<compile_context>
chip_gen: v5e
topology: v5e:2x2
jax: 0.10.0
libtpu: 0.0.40
codegen_flags: <defaults>
</compile_context>

<pallas_src>
import functools

import jax
import jax.numpy as jnp
from jax import lax
from jax.experimental import pallas as pl
from jax.experimental.pallas import tpu as pltpu


def _pair_kernel(im_ref, s_ref, drow_ref, dcol_ref,
                 row_max_ref, row_rank_ref, col_max_ref, col_rank_ref,
                 *, margin, tm, tn, n, ragged):
    """One (tm, tn) tile of scores = im @ s.T.

    Row direction (image->text): hinge max + strictly-smaller count vs the row's
    own diagonal, accumulated in the resident (tm, 1) output blocks over j.
    Column direction (text->image): per-(i, j) partial max/count tiles, combined
    by a tiny XLA reduction afterwards.
    """
    i = pl.program_id(0)          # row-panel index   ("parallel")
    j = pl.program_id(1)          # column-tile index ("arbitrary", innermost)

    @pl.when(j == 0)
    def _():
        row_max_ref[...] = jnp.zeros_like(row_max_ref)
        row_rank_ref[...] = jnp.zeros_like(row_rank_ref)

    scores = lax.dot_general(
        im_ref[...], s_ref[...],
        dimension_numbers=(((1,), (1,)), ((), ())),
        preferred_element_type=jnp.float32)                      # (tm, tn) on the MXU

    row0 = i * tm
    col0 = j * tn
    # Does this tile touch the global diagonal (the positive pairs)?
    has_diag = jnp.logical_and(col0 < row0 + tm, row0 < col0 + tn)

    def _keep_mask(drop_padded_cols):
        # Built only inside the (rare) masked branches: anti-eye on the global
        # diagonal, plus the padded rows/columns when N was padded.
        rows_g = row0 + lax.broadcasted_iota(jnp.int32, (tm, tn), 0)
        cols_g = col0 + lax.broadcasted_iota(jnp.int32, (tm, tn), 1)
        keep = rows_g != cols_g
        if ragged:
            if drop_padded_cols:
                keep = jnp.logical_and(keep, cols_g < n)
            else:
                keep = jnp.logical_and(keep, rows_g < n)
        return keep

    # ----- image -> text (row max / rank): finished before the delta2 path -----
    d1 = drow_ref[...]                                           # (tm, 1)
    cost_s = jnp.maximum(scores - (d1 - margin), 0.0)            # relu(margin + s - d1)
    lt1 = scores < d1                                            # strictly-smaller count

    def _accum_row(keep):
        cs = cost_s if keep is None else jnp.where(keep, cost_s, 0.0)
        l1 = lt1 if keep is None else jnp.logical_and(lt1, keep)
        row_max_ref[...] = jnp.maximum(
            row_max_ref[...], jnp.max(cs, axis=1, keepdims=True))
        row_rank_ref[...] += jnp.sum(
            l1.astype(jnp.float32), axis=1, keepdims=True)

    if ragged:
        row_needs_mask = jnp.logical_or(has_diag, col0 + tn > n)
    else:
        row_needs_mask = has_diag

    @pl.when(row_needs_mask)
    def _():
        _accum_row(_keep_mask(drop_padded_cols=True))

    @pl.when(jnp.logical_not(row_needs_mask))
    def _():
        _accum_row(None)

    # ----- text -> image (column max / rank) -----
    d2 = dcol_ref[...]                                           # (1, tn)
    cost_im = jnp.maximum(scores - (d2 - margin), 0.0)
    lt2 = scores < d2

    def _accum_col(keep):
        ci = cost_im if keep is None else jnp.where(keep, cost_im, 0.0)
        l2 = lt2 if keep is None else jnp.logical_and(lt2, keep)
        col_max_ref[...] = jnp.max(ci, axis=0, keepdims=True).reshape(1, 1, tn)
        col_rank_ref[...] = jnp.sum(
            l2.astype(jnp.float32), axis=0, keepdims=True).reshape(1, 1, tn)

    if ragged:
        col_needs_mask = jnp.logical_or(has_diag, row0 + tm > n)
    else:
        col_needs_mask = has_diag

    @pl.when(col_needs_mask)
    def _():
        _accum_col(_keep_mask(drop_padded_cols=False))

    @pl.when(jnp.logical_not(col_needs_mask))
    def _():
        _accum_col(None)


def _physical_vmem_bytes():
    try:
        info = pltpu.get_tpu_info()
        cap = getattr(info, "vmem_capacity_bytes", None)
        if cap:
            return int(cap)
    except Exception:
        pass
    return 64 << 20        # conservative fallback: v7x per-TensorCore VMEM


def _vmem_need_bytes(tm, tn, d, in_itemsize):
    lane = 128
    need = 2 * (tm + tn) * d * in_itemsize        # double-buffered im panel + s tile
    need += 2 * tm * lane * 4                     # drow input blocks (lane-padded)
    need += 2 * 8 * max(tn, lane) * 4             # dcol input blocks (sublane-padded)
    need += 2 * 2 * tm * lane * 4                 # row_max / row_rank output blocks
    need += 2 * 2 * 8 * max(tn, lane) * 4         # column partial output blocks
    need += 6 * tm * tn * 4                       # live (tm, tn) f32/i32 temporaries
    return need + (2 << 20)                       # slack


def _pick_tiles(n, d, col_tile, row_tile, in_itemsize, vmem_cap):
    tn = 128 if col_tile is None else int(col_tile)
    gj = -(-n // tn)
    n_pad = gj * tn
    if row_tile is not None:
        tm = int(row_tile)
        assert tm >= tn and tm % tn == 0, (tm, tn)
        n_pad = -(-n // tm) * tm
        return tm, tn, n_pad
    tm = tn
    # Widen the resident im row panel (cuts HBM re-streaming of s by tm/tn) only
    # when it adds no padding, keeps >= 2 (even) row panels for the two v7x
    # TensorCores, and fits the VMEM budget.
    for k in (8, 4, 2):
        cand = k * tn
        gi = -(-n // cand)
        if (gi * cand == n_pad and gi >= 2 and gi % 2 == 0
                and _vmem_need_bytes(cand, tn, d, in_itemsize) <= vmem_cap):
            tm = cand
            break
    return tm, tn, n_pad


def contrastive_loss(im, s, margin=0.0, *, col_tile=None, row_tile=None,
                     use_bf16=False):
    """Pallas TPU implementation of Loss.forward(im, s).  im, s: (N, D) float."""
    n, d = im.shape
    assert s.shape == (n, d), (im.shape, s.shape)

    compute_dtype = jnp.bfloat16 if use_bf16 else jnp.float32
    in_itemsize = jnp.dtype(compute_dtype).itemsize
    vmem_cap = max(_physical_vmem_bytes() - (8 << 20), 32 << 20)
    tm, tn, n_pad = _pick_tiles(n, d, col_tile, row_tile, in_itemsize, vmem_cap)
    gi, gj = n_pad // tm, n_pad // tn

    imc = im.astype(compute_dtype)
    sc = s.astype(compute_dtype)
    if n_pad != n:
        imc = jnp.pad(imc, ((0, n_pad - n), (0, 0)))
        sc = jnp.pad(sc, ((0, n_pad - n), (0, 0)))

    # scores[i, i] as a VPU row-wise multiply-sum (O(N*D), free next to the
    # O(N^2*D) main pass).  The diagonal element itself is eye-masked inside the
    # kernel, so ulp drift vs the MXU tiles cannot affect the result.
    drow = jnp.sum(imc.astype(jnp.float32) * sc.astype(jnp.float32),
                   axis=1, keepdims=True)                        # (n_pad, 1)
    dcol = drow.reshape(1, n_pad)                                # (1, n_pad)

    need = _vmem_need_bytes(tm, tn, d, in_itemsize)
    # TODO(synk): for very large D (need > vmem_cap) add a D grid axis with an
    # f32 score accumulator in scratch instead of just clamping the limit.
    vmem_limit = int(min(max(need, 32 << 20), vmem_cap))

    kernel = functools.partial(
        _pair_kernel, margin=float(margin), tm=tm, tn=tn, n=n,
        ragged=(n_pad != n))

    row_max, row_rank, col_max_p, col_rank_p = pl.pallas_call(
        kernel,
        grid=(gi, gj),
        in_specs=[
            pl.BlockSpec((tm, d), lambda i, j: (i, 0)),   # im row panel (resident over j)
            pl.BlockSpec((tn, d), lambda i, j: (j, 0)),   # s rows -> columns of scores
            pl.BlockSpec((tm, 1), lambda i, j: (i, 0)),   # diag for this row panel
            pl.BlockSpec((1, tn), lambda i, j: (0, j)),   # diag for this column tile
        ],
        out_specs=[
            pl.BlockSpec((tm, 1), lambda i, j: (i, 0)),        # row max  (resident over j)
            pl.BlockSpec((tm, 1), lambda i, j: (i, 0)),        # row rank (resident over j)
            pl.BlockSpec((1, 1, tn), lambda i, j: (i, 0, j)),  # col max partial per (i, j)
            pl.BlockSpec((1, 1, tn), lambda i, j: (i, 0, j)),  # col rank partial per (i, j)
        ],
        out_shape=(
            jax.ShapeDtypeStruct((n_pad, 1), jnp.float32),
            jax.ShapeDtypeStruct((n_pad, 1), jnp.float32),
            jax.ShapeDtypeStruct((gi, 1, n_pad), jnp.float32),
            jax.ShapeDtypeStruct((gi, 1, n_pad), jnp.float32),
        ),
        compiler_params=pltpu.CompilerParams(
            dimension_semantics=("parallel", "arbitrary"),
            vmem_limit_bytes=vmem_limit),
    )(imc, sc, drow, dcol)

    # Tiny O(gi * N) finalize in XLA: combine column partials, apply rank weights.
    cost_s = row_max[:n, 0]
    rank1 = row_rank[:n, 0]
    cost_im = jnp.max(col_max_p[:, 0, :], axis=0)[:n]
    rank2 = jnp.sum(col_rank_p[:, 0, :], axis=0)[:n]
    w1 = 1.0 / (rank1 + 1.0)
    w2 = 1.0 / (rank2 + 1.0)
    return jnp.sum(w1 * cost_s) + jnp.sum(w2 * cost_im)


def _reference_loss(im, s, margin=0.0):
    """Plain-JAX port of the PyTorch Loss.forward (rank via strictly-smaller count)."""
    scores = im @ s.T
    n = scores.shape[0]
    diag = jnp.diagonal(scores)[:, None]
    eye = jnp.eye(n, dtype=bool)
    cost_s = jnp.where(eye, 0.0, jnp.maximum(margin + scores - diag, 0.0)).max(axis=1)
    cost_im = jnp.where(eye, 0.0, jnp.maximum(margin + scores - diag.T, 0.0)).max(axis=0)
    rank1 = jnp.sum(jnp.where(eye, False, scores < diag), axis=1)
    rank2 = jnp.sum(jnp.where(eye, False, scores < diag.T), axis=0)
    w1 = 1.0 / (rank1 + 1.0)
    w2 = 1.0 / (rank2 + 1.0)
    return jnp.sum(w1 * cost_s) + jnp.sum(w2 * cost_im)


if __name__ == "__main__":
    key = jax.random.PRNGKey(0)
    k1, k2, k3, k4 = jax.random.split(key, 4)

    # Case 1: N=256, D=128 -> 2x2 grid of 128 tiles (exercises the j accumulation).
    N, D, LAT = 256, 128, 4
    z = jax.random.normal(k1, (N, LAT), jnp.float32)
    w = jax.random.normal(k2, (LAT, D), jnp.float32)
    im = z @ w + 0.5 * jax.random.normal(k3, (N, D), jnp.float32)
    s = z @ w + 0.5 * jax.random.normal(k4, (N, D), jnp.float32)
    im = im / jnp.linalg.norm(im, axis=1, keepdims=True)
    s = s / jnp.linalg.norm(s, axis=1, keepdims=True)

    out = jax.block_until_ready(contrastive_loss(im, s, margin=0.2))
    ref = _reference_loss(im, s, margin=0.2)
    assert jnp.allclose(out, ref, rtol=2e-3, atol=2e-3), (out, ref)

    # Case 2: ragged N / small D -> exercises the pad-and-mask edge-tile path.
    N2, D2 = 72, 96
    ka, kb = jax.random.split(jax.random.PRNGKey(1))
    im2 = jax.random.normal(ka, (N2, D2), jnp.float32)
    s2 = 0.6 * im2 + jax.random.normal(kb, (N2, D2), jnp.float32)
    im2 = im2 / jnp.linalg.norm(im2, axis=1, keepdims=True)
    s2 = s2 / jnp.linalg.norm(s2, axis=1, keepdims=True)

    out2 = jax.block_until_ready(contrastive_loss(im2, s2, margin=0.2))
    ref2 = _reference_loss(im2, s2, margin=0.2)
    assert jnp.allclose(out2, ref2, rtol=2e-3, atol=2e-3), (out2, ref2)

    # Opt-in bf16 MXU path (v6e/v7x throughput): ranks near exact ties may shift
    # by design, so only sanity-check that it compiles and produces a finite loss.
    out_bf = jax.block_until_ready(contrastive_loss(im, s, margin=0.2, use_bf16=True))
    assert bool(jnp.isfinite(out_bf)), out_bf

    print("KERNEL_OK")
</pallas_src>

<mosaic_0001>
module attributes {stable_mosaic.version = 11 : i64} {
  func.func @_pair_kernel(%arg0: i32, %arg1: i32, %arg2: memref<128x128xf32, #tpu.memory_space<vmem>>, %arg3: memref<128x128xf32, #tpu.memory_space<vmem>>, %arg4: memref<128x1xf32, #tpu.memory_space<vmem>>, %arg5: memref<1x128xf32, #tpu.memory_space<vmem>>, %arg6: memref<128x1xf32, #tpu.memory_space<vmem>>, %arg7: memref<128x1xf32, #tpu.memory_space<vmem>>, %arg8: memref<1x1x128xf32, #tpu.memory_space<vmem>>, %arg9: memref<1x1x128xf32, #tpu.memory_space<vmem>>) attributes {dimension_semantics = [#tpu.dimension_semantics<parallel>, #tpu.dimension_semantics<arbitrary>], iteration_bounds = array<i64: 2, 2>, scalar_prefetch = 0 : i64, scratch_operands = 0 : i64, tpu.core_type = #tpu.core_type<tc>, window_params = [{transform_indices = @transform_0, window_bounds = array<i64: 128, 128>}, {transform_indices = @transform_1, window_bounds = array<i64: 128, 128>}, {transform_indices = @transform_2, window_bounds = array<i64: 128, 1>}, {transform_indices = @transform_3, window_bounds = array<i64: 1, 128>}, {transform_indices = @transform_4, window_bounds = array<i64: 128, 1>}, {transform_indices = @transform_5, window_bounds = array<i64: 128, 1>}, {transform_indices = @transform_6, window_bounds = array<i64: 1, 1, 128>}, {transform_indices = @transform_7, window_bounds = array<i64: 1, 1, 128>}]} {
    %c0_i32 = arith.constant 0 : i32
    %0 = arith.cmpi eq, %arg1, %c0_i32 : i32
    %1 = arith.extui %0 : i1 to i32
    %c0_i32_0 = arith.constant 0 : i32
    %2 = arith.cmpi ne, %1, %c0_i32_0 : i32
    scf.if %2 {
      %cst_20 = arith.constant 0.000000e+00 : f32
      %41 = vector.broadcast %cst_20 : f32 to vector<128x1xf32>
      %c0_21 = arith.constant 0 : index
      %c0_22 = arith.constant 0 : index
      %42 = vector.load %arg6[%c0_21, %c0_22] : memref<128x1xf32, #tpu.memory_space<vmem>>, vector<128x1xf32>
      tpu.vector_store %arg6[%c0_21, %c0_22], %41 {strides = array<i32>} : memref<128x1xf32, #tpu.memory_space<vmem>>, vector<128x1xf32>,
      %cst_23 = arith.constant 0.000000e+00 : f32
      %43 = vector.broadcast %cst_23 : f32 to vector<128x1xf32>
      %c0_24 = arith.constant 0 : index
      %c0_25 = arith.constant 0 : index
      %44 = vector.load %arg7[%c0_24, %c0_25] : memref<128x1xf32, #tpu.memory_space<vmem>>, vector<128x1xf32>
      tpu.vector_store %arg7[%c0_24, %c0_25], %43 {strides = array<i32>} : memref<128x1xf32, #tpu.memory_space<vmem>>, vector<128x1xf32>,
    } else {
    }
    %c0 = arith.constant 0 : index
    %c0_1 = arith.constant 0 : index
    %3 = vector.load %arg2[%c0, %c0_1] : memref<128x128xf32, #tpu.memory_space<vmem>>, vector<128x128xf32>
    %c0_2 = arith.constant 0 : index
    %c0_3 = arith.constant 0 : index
    %4 = vector.load %arg3[%c0_2, %c0_3] : memref<128x128xf32, #tpu.memory_space<vmem>>, vector<128x128xf32>
    %cst = arith.constant dense<0.000000e+00> : vector<128x128xf32>
    %5 = tpu.matmul %3, %4, %cst {dimension_numbers = #tpu.dot_dimension_numbers<[1], [1], [0], [0], [0, 0, 1, 0], [], []>} : vector<128x128xf32>, vector<128x128xf32>, vector<128x128xf32> -> vector<128x128xf32>
    %c128_i32 = arith.constant 128 : i32
    %6 = arith.muli %arg0, %c128_i32 : i32
    %c128_i32_4 = arith.constant 128 : i32
    %7 = arith.muli %arg1, %c128_i32_4 : i32
    %c128_i32_5 = arith.constant 128 : i32
    %8 = arith.addi %6, %c128_i32_5 : i32
    %9 = arith.cmpi slt, %7, %8 : i32
    %c128_i32_6 = arith.constant 128 : i32
    %10 = arith.addi %7, %c128_i32_6 : i32
    %11 = arith.cmpi slt, %6, %10 : i32
    %12 = arith.andi %9, %11 : i1
    %c0_7 = arith.constant 0 : index
    %c0_8 = arith.constant 0 : index
    %13 = vector.load %arg4[%c0_7, %c0_8] : memref<128x1xf32, #tpu.memory_space<vmem>>, vector<128x1xf32>
    %cst_9 = arith.constant 2.000000e-01 : f32
    %14 = vector.broadcast %cst_9 : f32 to vector<128x1xf32>
    %15 = arith.subf %13, %14 : vector<128x1xf32>
    %16 = vector.broadcast %15 : vector<128x1xf32> to vector<128x128xf32>
    %17 = arith.subf %5, %16 : vector<128x128xf32>
    %cst_10 = arith.constant 0.000000e+00 : f32
    %18 = vector.broadcast %cst_10 : f32 to vector<128x128xf32>
    %19 = arith.maximumf %17, %18 : vector<128x128xf32>
    %20 = vector.broadcast %13 : vector<128x1xf32> to vector<128x128xf32>
    %21 = arith.cmpf olt, %5, %20 : vector<128x128xf32>
    %22 = arith.extui %12 : i1 to i32
    %c0_i32_11 = arith.constant 0 : i32
    %23 = arith.cmpi ne, %22, %c0_i32_11 : i32
    scf.if %23 {
      %41 = tpu.iota {dimensions = array<i32: 0>} : vector<128x128xi32>
      %42 = vector.broadcast %6 : i32 to vector<128x128xi32>
      %43 = arith.addi %42, %41 : vector<128x128xi32>
      %44 = tpu.iota {dimensions = array<i32: 1>} : vector<128x128xi32>
      %45 = vector.broadcast %7 : i32 to vector<128x128xi32>
      %46 = arith.addi %45, %44 : vector<128x128xi32>
      %47 = arith.cmpi ne, %43, %46 : vector<128x128xi32>
      %cst_20 = arith.constant 0.000000e+00 : f32
      %48 = vector.broadcast %cst_20 : f32 to vector<128x128xf32>
      %49 = arith.select %47, %19, %48 : vector<128x128xi1>, vector<128x128xf32>
      %50 = arith.andi %21, %47 : vector<128x128xi1>
      %c0_21 = arith.constant 0 : index
      %c0_22 = arith.constant 0 : index
      %51 = vector.load %arg6[%c0_21, %c0_22] : memref<128x1xf32, #tpu.memory_space<vmem>>, vector<128x1xf32>
      %cst_23 = arith.constant dense<0xFF800000> : vector<128xf32>
      %52 = vector.multi_reduction <maximumf>, %49, %cst_23 [1] : vector<128x128xf32> to vector<128xf32>
      %53 = vector.shape_cast %52 : vector<128xf32> to vector<128x1xf32>
      %54 = arith.maximumf %51, %53 : vector<128x1xf32>
      %c0_24 = arith.constant 0 : index
      %c0_25 = arith.constant 0 : index
      %55 = vector.load %arg6[%c0_24, %c0_25] : memref<128x1xf32, #tpu.memory_space<vmem>>, vector<128x1xf32>
      tpu.vector_store %arg6[%c0_24, %c0_25], %54 {strides = array<i32>} : memref<128x1xf32, #tpu.memory_space<vmem>>, vector<128x1xf32>,
      %c0_26 = arith.constant 0 : index
      %c0_27 = arith.constant 0 : index
      %56 = vector.load %arg7[%c0_26, %c0_27] : memref<128x1xf32, #tpu.memory_space<vmem>>, vector<128x1xf32>
      %57 = arith.extui %50 : vector<128x128xi1> to vector<128x128xi32>
      %58 = arith.sitofp %57 : vector<128x128xi32> to vector<128x128xf32>
      %cst_28 = arith.constant dense<0.000000e+00> : vector<128xf32>
      %59 = vector.multi_reduction <add>, %58, %cst_28 [1] : vector<128x128xf32> to vector<128xf32>
      %60 = vector.shape_cast %59 : vector<128xf32> to vector<128x1xf32>
      %61 = arith.addf %56, %60 : vector<128x1xf32>
      %c0_29 = arith.constant 0 : index
      %c0_30 = arith.constant 0 : index
      %62 = vector.load %arg7[%c0_29, %c0_30] : memref<128x1xf32, #tpu.memory_space<vmem>>, vector<128x1xf32>
      tpu.vector_store %arg7[%c0_29, %c0_30], %61 {strides = array<i32>} : memref<128x1xf32, #tpu.memory_space<vmem>>, vector<128x1xf32>,
    } else {
    }
    %true = arith.constant true
    %24 = arith.xori %12, %true : i1
    %25 = arith.extui %24 : i1 to i32
    %c0_i32_12 = arith.constant 0 : i32
    %26 = arith.cmpi ne, %25, %c0_i32_12 : i32
    scf.if %26 {
      %c0_20 = arith.constant 0 : index
      %c0_21 = arith.constant 0 : index
      %41 = vector.load %arg6[%c0_20, %c0_21] : memref<128x1xf32, #tpu.memory_space<vmem>>, vector<128x1xf32>
      %cst_22 = arith.constant dense<0xFF800000> : vector<128xf32>
      %42 = vector.multi_reduction <maximumf>, %19, %cst_22 [1] : vector<128x128xf32> to vector<128xf32>
      %43 = vector.shape_cast %42 : vector<128xf32> to vector<128x1xf32>
      %44 = arith.maximumf %41, %43 : vector<128x1xf32>
      %c0_23 = arith.constant 0 : index
      %c0_24 = arith.constant 0 : index
      %45 = vector.load %arg6[%c0_23, %c0_24] : memref<128x1xf32, #tpu.memory_space<vmem>>, vector<128x1xf32>
      tpu.vector_store %arg6[%c0_23, %c0_24], %44 {strides = array<i32>} : memref<128x1xf32, #tpu.memory_space<vmem>>, vector<128x1xf32>,
      %c0_25 = arith.constant 0 : index
      %c0_26 = arith.constant 0 : index
      %46 = vector.load %arg7[%c0_25, %c0_26] : memref<128x1xf32, #tpu.memory_space<vmem>>, vector<128x1xf32>
      %47 = arith.extui %21 : vector<128x128xi1> to vector<128x128xi32>
      %48 = arith.sitofp %47 : vector<128x128xi32> to vector<128x128xf32>
      %cst_27 = arith.constant dense<0.000000e+00> : vector<128xf32>
      %49 = vector.multi_reduction <add>, %48, %cst_27 [1] : vector<128x128xf32> to vector<128xf32>
      %50 = vector.shape_cast %49 : vector<128xf32> to vector<128x1xf32>
      %51 = arith.addf %46, %50 : vector<128x1xf32>
      %c0_28 = arith.constant 0 : index
      %c0_29 = arith.constant 0 : index
      %52 = vector.load %arg7[%c0_28, %c0_29] : memref<128x1xf32, #tpu.memory_space<vmem>>, vector<128x1xf32>
      tpu.vector_store %arg7[%c0_28, %c0_29], %51 {strides = array<i32>} : memref<128x1xf32, #tpu.memory_space<vmem>>, vector<128x1xf32>,
    } else {
    }
    %c0_13 = arith.constant 0 : index
    %c0_14 = arith.constant 0 : index
    %27 = vector.load %arg5[%c0_13, %c0_14] : memref<1x128xf32, #tpu.memory_space<vmem>>, vector<1x128xf32>
    %cst_15 = arith.constant 2.000000e-01 : f32
    %28 = vector.broadcast %cst_15 : f32 to vector<1x128xf32>
    %29 = arith.subf %27, %28 : vector<1x128xf32>
    %30 = vector.broadcast %29 : vector<1x128xf32> to vector<128x128xf32>
    %31 = arith.subf %5, %30 : vector<128x128xf32>
    %cst_16 = arith.constant 0.000000e+00 : f32
    %32 = vector.broadcast %cst_16 : f32 to vector<128x128xf32>
    %33 = arith.maximumf %31, %32 : vector<128x128xf32>
    %34 = vector.broadcast %27 : vector<1x128xf32> to vector<128x128xf32>
    %35 = arith.cmpf olt, %5, %34 : vector<128x128xf32>
    %36 = arith.extui %12 : i1 to i32
    %c0_i32_17 = arith.constant 0 : i32
    %37 = arith.cmpi ne, %36, %c0_i32_17 : i32
    scf.if %37 {
      %41 = tpu.iota {dimensions = array<i32: 0>} : vector<128x128xi32>
      %42 = vector.broadcast %6 : i32 to vector<128x128xi32>
      %43 = arith.addi %42, %41 : vector<128x128xi32>
      %44 = tpu.iota {dimensions = array<i32: 1>} : vector<128x128xi32>
      %45 = vector.broadcast %7 : i32 to vector<128x128xi32>
      %46 = arith.addi %45, %44 : vector<128x128xi32>
      %47 = arith.cmpi ne, %43, %46 : vector<128x128xi32>
      %cst_20 = arith.constant 0.000000e+00 : f32
      %48 = vector.broadcast %cst_20 : f32 to vector<128x128xf32>
      %49 = arith.select %47, %33, %48 : vector<128x128xi1>, vector<128x128xf32>
      %50 = arith.andi %35, %47 : vector<128x128xi1>
      %cst_21 = arith.constant dense<0xFF800000> : vector<128xf32>
      %51 = vector.multi_reduction <maximumf>, %49, %cst_21 [0] : vector<128x128xf32> to vector<128xf32>
      %52 = vector.shape_cast %51 : vector<128xf32> to vector<1x128xf32>
      %53 = vector.shape_cast %52 : vector<1x128xf32> to vector<1x1x128xf32>
      %c0_22 = arith.constant 0 : index
      %c0_23 = arith.constant 0 : index
      %c0_24 = arith.constant 0 : index
      %54 = vector.load %arg8[%c0_22, %c0_23, %c0_24] : memref<1x1x128xf32, #tpu.memory_space<vmem>>, vector<1x1x128xf32>
      tpu.vector_store %arg8[%c0_22, %c0_23, %c0_24], %53 {strides = array<i32>} : memref<1x1x128xf32, #tpu.memory_space<vmem>>, vector<1x1x128xf32>,
      %55 = arith.extui %50 : vector<128x128xi1> to vector<128x128xi32>
      %56 = arith.sitofp %55 : vector<128x128xi32> to vector<128x128xf32>
      %cst_25 = arith.constant dense<0.000000e+00> : vector<128xf32>
      %57 = vector.multi_reduction <add>, %56, %cst_25 [0] : vector<128x128xf32> to vector<128xf32>
      %58 = vector.shape_cast %57 : vector<128xf32> to vector<1x128xf32>
      %59 = vector.shape_cast %58 : vector<1x128xf32> to vector<1x1x128xf32>
      %c0_26 = arith.constant 0 : index
      %c0_27 = arith.constant 0 : index
      %c0_28 = arith.constant 0 : index
      %60 = vector.load %arg9[%c0_26, %c0_27, %c0_28] : memref<1x1x128xf32, #tpu.memory_space<vmem>>, vector<1x1x128xf32>
      tpu.vector_store %arg9[%c0_26, %c0_27, %c0_28], %59 {strides = array<i32>} : memref<1x1x128xf32, #tpu.memory_space<vmem>>, vector<1x1x128xf32>,
    } else {
    }
    %true_18 = arith.constant true
    %38 = arith.xori %12, %true_18 : i1
    %39 = arith.extui %38 : i1 to i32
    %c0_i32_19 = arith.constant 0 : i32
    %40 = arith.cmpi ne, %39, %c0_i32_19 : i32
    scf.if %40 {
      %cst_20 = arith.constant dense<0xFF800000> : vector<128xf32>
      %41 = vector.multi_reduction <maximumf>, %33, %cst_20 [0] : vector<128x128xf32> to vector<128xf32>
      %42 = vector.shape_cast %41 : vector<128xf32> to vector<1x128xf32>
      %43 = vector.shape_cast %42 : vector<1x128xf32> to vector<1x1x128xf32>
      %c0_21 = arith.constant 0 : index
      %c0_22 = arith.constant 0 : index
      %c0_23 = arith.constant 0 : index
      %44 = vector.load %arg8[%c0_21, %c0_22, %c0_23] : memref<1x1x128xf32, #tpu.memory_space<vmem>>, vector<1x1x128xf32>
      tpu.vector_store %arg8[%c0_21, %c0_22, %c0_23], %43 {strides = array<i32>} : memref<1x1x128xf32, #tpu.memory_space<vmem>>, vector<1x1x128xf32>,
      %45 = arith.extui %35 : vector<128x128xi1> to vector<128x128xi32>
      %46 = arith.sitofp %45 : vector<128x128xi32> to vector<128x128xf32>
      %cst_24 = arith.constant dense<0.000000e+00> : vector<128xf32>
      %47 = vector.multi_reduction <add>, %46, %cst_24 [0] : vector<128x128xf32> to vector<128xf32>
      %48 = vector.shape_cast %47 : vector<128xf32> to vector<1x128xf32>
      %49 = vector.shape_cast %48 : vector<1x128xf32> to vector<1x1x128xf32>
      %c0_25 = arith.constant 0 : index
      %c0_26 = arith.constant 0 : index
      %c0_27 = arith.constant 0 : index
      %50 = vector.load %arg9[%c0_25, %c0_26, %c0_27] : memref<1x1x128xf32, #tpu.memory_space<vmem>>, vector<1x1x128xf32>
      tpu.vector_store %arg9[%c0_25, %c0_26, %c0_27], %49 {strides = array<i32>} : memref<1x1x128xf32, #tpu.memory_space<vmem>>, vector<1x1x128xf32>,
    } else {
    }
    return
  }
  func.func @transform_0(%arg0: i32, %arg1: i32) -> (i32, i32) {
    %c0_i32 = arith.constant 0 : i32
    %c0_i32_0 = arith.constant 0 : i32
    return %arg0, %c0_i32 : i32, i32
  }
  func.func @transform_1(%arg0: i32, %arg1: i32) -> (i32, i32) {
    %c0_i32 = arith.constant 0 : i32
    %c0_i32_0 = arith.constant 0 : i32
    return %arg1, %c0_i32 : i32, i32
  }
  func.func @transform_2(%arg0: i32, %arg1: i32) -> (i32, i32) {
    %c0_i32 = arith.constant 0 : i32
    %c0_i32_0 = arith.constant 0 : i32
    return %arg0, %c0_i32 : i32, i32
  }
  func.func @transform_3(%arg0: i32, %arg1: i32) -> (i32, i32) {
    %c0_i32 = arith.constant 0 : i32
    %c0_i32_0 = arith.constant 0 : i32
    return %c0_i32, %arg1 : i32, i32
  }
  func.func @transform_4(%arg0: i32, %arg1: i32) -> (i32, i32) {
    %c0_i32 = arith.constant 0 : i32
    %c0_i32_0 = arith.constant 0 : i32
    return %arg0, %c0_i32 : i32, i32
  }
  func.func @transform_5(%arg0: i32, %arg1: i32) -> (i32, i32) {
    %c0_i32 = arith.constant 0 : i32
    %c0_i32_0 = arith.constant 0 : i32
    return %arg0, %c0_i32 : i32, i32
  }
  func.func @transform_6(%arg0: i32, %arg1: i32) -> (i32, i32, i32) {
    %c0_i32 = arith.constant 0 : i32
    %c0_i32_0 = arith.constant 0 : i32
    return %arg0, %c0_i32, %arg1 : i32, i32, i32
  }
  func.func @transform_7(%arg0: i32, %arg1: i32) -> (i32, i32, i32) {
    %c0_i32 = arith.constant 0 : i32
    %c0_i32_0 = arith.constant 0 : i32
    return %arg0, %c0_i32, %arg1 : i32, i32, i32
  }
}

</mosaic_0001>

<bundles_post_ra>
// kernel: tpu_custom_call.1
= control target key start
LH: loop header
LB: loop body
LE: loop exit
PB: predicated region body
PF: predicated region fallthrough
CT: control target
= control target key end

     0   :  { %s3770_s0 = inlined_call_operand.vmem [shape: f32[256,128], index: 0, kind: input, shape index: {}]   ;;  %s3771_s1 = inlined_call_operand.hbm [shape: f32[256,128], index: 1, kind: input, shape index: {}]   ;;  %s3772_s2 = inlined_call_operand.vmem [shape: f32[256,1], index: 2, kind: input, shape index: {}]   ;;  %s3773_s3 = inlined_call_operand.vmem [shape: f32[1,256], index: 3, kind: input, shape index: {}]   ;;  %s3774_s4 = inlined_call_operand.vmem [shape: f32[256,1], index: 4, kind: output, shape index: {0}]   ;;  %s3775_s5 = inlined_call_operand.vmem [shape: f32[256,1], index: 5, kind: output, shape index: {1}]   ;;  %s3776_s6 = inlined_call_operand.hbm [shape: f32[2,1,256], index: 6, kind: output, shape index: {2}]   ;;  %s3777_s7 = inlined_call_operand.hbm [shape: f32[2,1,256], index: 7, kind: output, shape index: {3}]  }
   0x1   :  { %3820 = sst [smem:[#allocation33_spill]] %s3771_s1 }
   0x2   :  { %13 = vsyncpa [#allocation3], 0 }
   0x3   :  { %15 = vsyncpa [#allocation3 + $0x1], 0 }
   0x4   :  { %16 = vsyncpa [#allocation4], 0 }
   0x5   :  { %18 = vsyncpa [#allocation4 + $0x1], 0 }
   0x6   :  { %19 = vsyncpa [#allocation7], 0 }
   0x7   :  { %21 = vsyncpa [#allocation7 + $0x1], 0  ;;  %s2318_s24 = smov 0   ;;  %s2320_s25 = smov 0  }
   0x8   :  { %s2322_s26 = smov 0   ;;  %s2324_s27 = smov 0  }
   0x9   :  { %s2326_s28 = smov 0   ;;  %s2328_s29 = smov 0  }
   0xa   :  { %s2330_s30 = smov 0   ;;  %s2332_s8 = smov 0  }
   0xb   :  { %s2334_s9 = smov 0   ;;  %s2336_s10 = smov 0  }
   0xc   :  { %s2338_s11 = smov 0  }
   0xd LB: > { %3821 = sst [smem:[#allocation11_spill]] %s2228_s24  ;;  %s1811_s12 = sadd.s32 4294967295, %s2268_s11   ;;  %s2268_s11 = sphi %s2338_s11, %s27_s11   ;;  %s2264_s10 = sphi %s2336_s10, %s3946_s10   ;;  %s2260_s9 = sphi %s2334_s9, %s3945_s9   ;;  %s2256_s8 = sphi %s2332_s8, %s3944_s8   ;;  %s2252_s30 = sphi %s2330_s30, %s3943_s30   ;;  %s2248_s29 = sphi %s2328_s29, %s3942_s29   ;;  %s2244_s28 = sphi %s2326_s28, %s3941_s28   ;;  %s2240_s27 = sphi %s2324_s27, %s3940_s27   ;;  %s2236_s26 = sphi %s2322_s26, %s3939_s26   ;;  %s2232_s25 = sphi %s2320_s25, %s3948_s25   ;;  %s2228_s24 = sphi %s2318_s24, %s3947_s24  }
   0xe   : > { %3822 = sst [smem:[#allocation12_spill]] %s2236_s26  ;;  %s1812_s13 = sadd.s32 4294967294, %s2268_s11  }
   0xf   : > { %3823 = sst [smem:[#allocation13_spill]] %s2244_s28  ;;  %s36_s14 = sadd.s32 1, %s2260_s9 }
  0x10   : > { %3824 = sst [smem:[#allocation14_spill]] %s2248_s29  ;;  %s39_s15 = sadd.s32 1, %s2264_s10 }
  0x11   : > { %3825 = sst [smem:[#allocation15_spill]] %s2260_s9  ;;  %p37_p0 = scmp.ge.s32.totalorder %s36_s14, 2 }
  0x12   : > { %3826 = sst [smem:[#allocation16_spill]] %s2264_s10  ;;  %s72_s16 = sadd.s32 1, %s2248_s29 }
  0x13   : > { %p79_p1 = scmp.ne.s32.totalorder %s2248_s29, %s2244_s28  ;;  %p80_p2 = scmp.eq.s32.totalorder %s2268_s11, 0 }
  0x14   : > { %s3950_s14 = smov (%p37_p0, %s36_s14), 0  ;;  %s3952_s15 = smov (!%p37_p0, %s39_s15), %s2264_s10 }
  0x15   : > { %3827 = sst [smem:[#allocation17_spill]] %s3950_s14  ;;  %s69_s17 = ssub.s32 %s2260_s9, %s3950_s14 }
  0x16   : > { %p2384_p3 = por %p80_p2, %p79_p1  ;;  %p41_p4 = scmp.ge.s32.totalorder %s3952_s15, 2 }
  0x17   : > { %p70_p5 = scmp.eq.s32.totalorder %s69_s17, 0  ;;  %p85_p6 = scmp.ne.s32.totalorder %s2244_s28, %s2240_s27 }
  0x18   : > { %p86_p7 = scmp.eq.s32.totalorder %s1811_s12, 0  ;;  %s3954_s15 = smov (%p41_p4, %s3952_s15), 0 }
  0x19   : > { %3829 = sst [smem:[#allocation18_spill]] %s3954_s15  ;;  %s199_s21 = ssub.s32 %s2264_s10, %s3954_s15 }
  0x1a   : > { %s2392_s19 = scalar_select %p70_p5, %s2248_s29, %s72_s16  }
  0x1b   : > { %p2394_p8 = por %p86_p7, %p85_p6  ;;  %s201_s22 = sor.u32 %s199_s21, %s69_s17 }
  0x1c   : > { %3830 = sst [smem:[#allocation19_spill]] %s2392_s19  ;;  %s204_s23 = sadd.s32 1, %s2236_s26 }
  0x1d   : > { %p202_p9 = scmp.eq.s32.totalorder %s201_s22, 0  ;;  %p214_p10 = scmp.ne.s32.totalorder %s2236_s26, %s2232_s25 }
  0x1e   : > { %p215_p11 = scmp.eq.s32.totalorder %s1811_s12, 3  ;;  %p220_p12 = scmp.ne.s32.totalorder %s2232_s25, %s2228_s24 }
  0x1f   : > { %s2406_s27 = scalar_select %p202_p9, %s2236_s26, %s204_s23  }
  0x20   : > { %p2408_p13 = por %p215_p11, %p214_p10  ;;  %p221_p0 = scmp.eq.s32.totalorder %s1812_s13, 3 }
  0x21   : > { %3832 = sst [smem:[#allocation20_spill]] %s2406_s27  ;;  %p1982_p1 = scmp.lt.s32.totalorder %s2268_s11, 4 }
  0x22   : > { %p2413_p2 = por %p221_p0, %p220_p12  ;;  %s278_s17 = sand.u32 1, %s2248_s29  }
  0x23   : > { %s1815_s21 = sshll.u32 %s278_s17, 7  ;;  %s1916_s22 = sshll.u32 %s2260_s9, 7 }
  0x24   : > { %s3835_s1 = sld [smem:[#allocation33_spill]]  ;;  %s282_s23 = scalar_lea.vmem [#allocation2], %s1815_s21 }
  0x25   : > { %s290_s19 = sshll.u32 %s282_s23, 4  ;;  %p1972_p4 = pnand %p1982_p1, %p2384_p3  ;;  %s291_s19 = int_to_ptr.vmem [resolvable:$true] %s290_s19 }
  0x26   : > { %p1818_p5 = scmp.ge.s32.totalorder %s2268_s11, 1  ;;  %s279_s13 = scalar_lea.sflag [#allocation3], %s278_s17 }
  0x27   : > { %s2270_s26 = smov 128   ;;  %s2271_s24 = smov 8  }
  0x28   : > { %p313_p6 = scmp.lt.s32.totalorder %s2268_s11, 5 }
  0x2a   : > { %s287_s10 = scalar_lea.hbm %s3835_s1, %s1916_s22  ;;  %p314_p7 = pnand %p1818_p5, %p313_p6 }
  0x2b   : > { %s288_s27 = sshll.u32 %s287_s10, 4  ;;  %s289_s27 = int_to_ptr.hbm [resolvable:$true] %s288_s27 }
  0x2c   : > { %1974 = dma.hbm_to_vmem [thread:$0]  (!%p1972_p4), %s289_s27, 2048, %s291_s19, %s279_s13, %s2270_s26, %s2270_s26, %s2271_s24  }
  0x2d   : > { %317 = sbr.rel (%p314_p7) target bundleno = 892 (0x37c), region = 36 }
  0x32   : > { %s319_s9 = sand.u32 1, %s2244_s28  }
  0x33   : > { %s1819_s15 = sshll.u32 %s319_s9, 7  ;;  %s320_s22 = scalar_lea.sflag [#allocation3], %s319_s9 }
  0x34   : > { %s2427_s21 = scalar_lea.vmem [#allocation2], %s1819_s15 }
  0x35   : > { %2215 = dma.done.wait (%p2394_p8), %s320_s22, 2048  }
  0x36   : > { %2217 = vsyncadd (%p2394_p8), %s320_s22, 4294965248  ;;  %s2434_s24 = sand.u32 1, %s2232_s25   ;;  %s1820_s26 = sshll.u32 %s2256_s8, 4 }
  0x37   : > { %p382_p3 = scmp.lt.s32.totalorder %s1820_s26, 31  ;;  %p394_p9 = scmp.lt.s32.totalorder %s2252_s30, 1 }
  0x38   : > { %s2465_s19 = scalar_lea.vmem [#allocation5], %s2434_s24  ;;  %s2468_s20 = scalar_lea.vmem [#allocation6], %s2434_s24 }
  0x39   : > { %s3956_s26 = smov (!%p382_p3, %s1820_s26), 31  ;;  %p1828_p8 = scmp.ne.s32.totalorder %s2252_s30, 0 }
  0x3a   : > { %s395_s9 = scalar_select %p394_p9, %s2252_s30, 1 }
  0x3b   : > { %s1821_s10 = sshll.u32 %s3956_s26, 3  ;;  %412 = sbr.rel (%p1828_p8) target bundleno = 97 (0x61), region = 44 }
  0x3c   : > { %s2442_s27 = scalar_lea.vmem %s3770_s0, %s1821_s10  ;;  %s2447_s12 = scalar_lea.vmem %s3772_s2, %s1821_s10 }
  0x3d   : > { %s2452_s15 = scalar_lea.vmem %s3773_s3, %s395_s9  ;;  %s2457_s29 = scalar_lea.vmem %s3774_s4, %s1821_s10 }
  0x3e   : > { %s2462_s18 = scalar_lea.vmem %s3775_s5, %s1821_s10 }
  0x40   : > { %vm413_vm0 = vcmask 7168   ;;  %v2272_v0 = vmov 0.0  }
  0x41   : > { %414 = vst.msk [vmem:[%s2457_s29] sm:$0xff] %vm413_vm0, %v2272_v0 }
  0x42   : > { %415 = vst.msk [vmem:[%s2457_s29 + $0x8] sm:$0xff] %vm413_vm0, %v2272_v0 }
  0x43   : > { %416 = vst.msk [vmem:[%s2457_s29 + $0x10] sm:$0xff] %vm413_vm0, %v2272_v0 }
  0x44   : > { %417 = vst.msk [vmem:[%s2457_s29 + $0x18] sm:$0xff] %vm413_vm0, %v2272_v0 }
  0x45   : > { %418 = vst.msk [vmem:[%s2457_s29 + $0x20] sm:$0xff] %vm413_vm0, %v2272_v0 }
  0x46   : > { %419 = vst.msk [vmem:[%s2457_s29 + $0x28] sm:$0xff] %vm413_vm0, %v2272_v0 }
  0x47   : > { %420 = vst.msk [vmem:[%s2457_s29 + $0x30] sm:$0xff] %vm413_vm0, %v2272_v0 }
  0x48   : > { %421 = vst.msk [vmem:[%s2457_s29 + $0x38] sm:$0xff] %vm413_vm0, %v2272_v0 }
  0x49   : > { %422 = vst.msk [vmem:[%s2457_s29 + $0x40] sm:$0xff] %vm413_vm0, %v2272_v0 }
  0x4a   : > { %423 = vst.msk [vmem:[%s2457_s29 + $0x48] sm:$0xff] %vm413_vm0, %v2272_v0 }
  0x4b   : > { %424 = vst.msk [vmem:[%s2457_s29 + $0x50] sm:$0xff] %vm413_vm0, %v2272_v0 }
  0x4c   : > { %425 = vst.msk [vmem:[%s2457_s29 + $0x58] sm:$0xff] %vm413_vm0, %v2272_v0 }
  0x4d   : > { %426 = vst.msk [vmem:[%s2457_s29 + $0x60] sm:$0xff] %vm413_vm0, %v2272_v0 }
  0x4e   : > { %427 = vst.msk [vmem:[%s2457_s29 + $0x68] sm:$0xff] %vm413_vm0, %v2272_v0 }
  0x4f   : > { %428 = vst.msk [vmem:[%s2457_s29 + $0x70] sm:$0xff] %vm413_vm0, %v2272_v0 }
  0x50   : > { %429 = vst.msk [vmem:[%s2457_s29 + $0x78] sm:$0xff] %vm413_vm0, %v2272_v0 }
  0x51   : > { %430 = vst.msk [vmem:[%s2462_s18] sm:$0xff] %vm413_vm0, %v2272_v0 }
  0x52   : > { %431 = vst.msk [vmem:[%s2462_s18 + $0x8] sm:$0xff] %vm413_vm0, %v2272_v0 }
  0x53   : > { %432 = vst.msk [vmem:[%s2462_s18 + $0x10] sm:$0xff] %vm413_vm0, %v2272_v0 }
  0x54   : > { %433 = vst.msk [vmem:[%s2462_s18 + $0x18] sm:$0xff] %vm413_vm0, %v2272_v0 }
  0x55   : > { %434 = vst.msk [vmem:[%s2462_s18 + $0x20] sm:$0xff] %vm413_vm0, %v2272_v0 }
  0x56   : > { %435 = vst.msk [vmem:[%s2462_s18 + $0x28] sm:$0xff] %vm413_vm0, %v2272_v0 }
  0x57   : > { %436 = vst.msk [vmem:[%s2462_s18 + $0x30] sm:$0xff] %vm413_vm0, %v2272_v0 }
  0x58   : > { %437 = vst.msk [vmem:[%s2462_s18 + $0x38] sm:$0xff] %vm413_vm0, %v2272_v0 }
  0x59   : > { %438 = vst.msk [vmem:[%s2462_s18 + $0x40] sm:$0xff] %vm413_vm0, %v2272_v0 }
  0x5a   : > { %439 = vst.msk [vmem:[%s2462_s18 + $0x48] sm:$0xff] %vm413_vm0, %v2272_v0 }
  0x5b   : > { %440 = vst.msk [vmem:[%s2462_s18 + $0x50] sm:$0xff] %vm413_vm0, %v2272_v0 }
  0x5c   : > { %441 = vst.msk [vmem:[%s2462_s18 + $0x58] sm:$0xff] %vm413_vm0, %v2272_v0 }
  0x5d   : > { %442 = vst.msk [vmem:[%s2462_s18 + $0x60] sm:$0xff] %vm413_vm0, %v2272_v0 }
  0x5e   : > { %443 = vst.msk [vmem:[%s2462_s18 + $0x68] sm:$0xff] %vm413_vm0, %v2272_v0 }
  0x5f   : > { %444 = vst.msk [vmem:[%s2462_s18 + $0x70] sm:$0xff] %vm413_vm0, %v2272_v0 }
  0x60   : > { %445 = vst.msk [vmem:[%s2462_s18 + $0x78] sm:$0xff] %vm413_vm0, %v2272_v0 }
  0x61 PF: > { %v477_v1 = vld [vmem:[%s2427_s21 + $0x78] sm:$0xff]  ;;  %v2537_v2 = vld [vmem:[%s2447_s12 + $0x20] sm:$0xff]  ;;  %v2540_v3 = vld [vmem:[%s2447_s12 + $0x10] sm:$0xff]  ;;  %v2273_v8 = vmov 0   ;;  %s2648_s1 = sshll.u32 %s2256_s8, 7  ;;  %s2651_s28 = sshll.u32 %s2252_s30, 7 }
  0x62   : > { %478 = vmatpush.xpose.msra.mxu0 %v477_v1  ;;  %1917 = vmatpush.xpose.msra.mxu1 %v477_v1  ;;  %v1835_v4 = vadd.f32 -0.2, %v2537_v2  ;;  %v1833_v5 = vadd.f32 -0.2, %v2540_v3  ;;  %v2545_v6 = vld [vmem:[%s2447_s12] sm:$0xff]  ;;  %v476_v9 = vld [vmem:[%s2427_s21 + $0x70] sm:$0xff] }
  0x63   : > { %1918 = vmatpush.xpose.msra.mxu2 %v477_v1  ;;  %1919 = vmatpush.xpose.msra.mxu3 %v477_v1  ;;  %v1831_v7 = vadd.f32 -0.2, %v2545_v6  ;;  %v2550_v10 = vld [vmem:[%s2447_s12 + $0x28] sm:$0xff]  ;;  %v2553_v11 = vld [vmem:[%s2447_s12 + $0x18] sm:$0xff]  ;;  %v474_v17 = vld [vmem:[%s2427_s21 + $0x60] sm:$0xff]  ;;  %s547_s9 = sadd.s32 128, %s2651_s28 }
  0x64   : > { %2082 = vset.pattern.permute.xlu2 %v2273_v8  ;;  %2081 = vset.pattern.permute.xlu1 %v2273_v8  ;;  %v2556_v12 = vld [vmem:[%s2447_s12 + $0x8] sm:$0xff]  ;;  %v1836_v14 = vadd.f32 -0.2, %v2550_v10  ;;  %v1834_v15 = vadd.f32 -0.2, %v2553_v11  ;;  %v2564_v18 = vld [vmem:[%s2447_s12 + $0x40] sm:$0xff]  ;;  %p548_p11 = scmp.lt.s32.totalorder %s2648_s1, %s547_s9 }
  0x65   : > { %2080 = vset.pattern.permute.xlu0 %v2273_v8  ;;  %605 = vperm.xlu2 %2082, %v1835_v4   ;;  %v475_v13 = vld [vmem:[%s2427_s21 + $0x68] sm:$0xff]  ;;  %v1832_v16 = vadd.f32 -0.2, %v2556_v12  ;;  %v2567_v19 = vld [vmem:[%s2447_s12 + $0x38] sm:$0xff]  ;;  %v2570_v20 = vld [vmem:[%s2447_s12 + $0x30] sm:$0xff] }
  0x66   : > { %595 = vperm.xlu1 %2081, %v1833_v5   ;;  %585 = vperm.xlu0 %2080, %v1831_v7   ;;  %v473_v21 = vld [vmem:[%s2427_s21 + $0x58] sm:$0xff]  ;;  %v1839_v22 = vadd.f32 -0.2, %v2564_v18  ;;  %v1838_v23 = vadd.f32 -0.2, %v2567_v19  ;;  %v472_v25 = vld [vmem:[%s2427_s21 + $0x50] sm:$0xff] }
  0x67   : > { %479 = vmatpush.xpose.msra.mxu0 %v476_v9  ;;  %1920 = vmatpush.xpose.msra.mxu1 %v476_v9  ;;  %v1837_v24 = vadd.f32 -0.2, %v2570_v20  ;;  %v2578_v26 = vld [vmem:[%s2447_s12 + $0x58] sm:$0xff]  ;;  %v2581_v27 = vld [vmem:[%s2447_s12 + $0x50] sm:$0xff]  ;;  %v2584_v28 = vld [vmem:[%s2447_s12 + $0x48] sm:$0xff] }
  0x68   : > { %1921 = vmatpush.xpose.msra.mxu2 %v476_v9  ;;  %1922 = vmatpush.xpose.msra.mxu3 %v476_v9  ;;  %v471_v29 = vld [vmem:[%s2427_s21 + $0x48] sm:$0xff]  ;;  %v1842_v30 = vadd.f32 -0.2, %v2578_v26  ;;  %v1841_v31 = vadd.f32 -0.2, %v2581_v27  ;;  %v470_v33 = vld [vmem:[%s2427_s21 + $0x40] sm:$0xff] }
  0x69   : > { %v1840_v32 = vadd.f32 -0.2, %v2584_v28  ;;  %v2592_v34 = vld [vmem:[%s2447_s12 + $0x70] sm:$0xff]  ;;  %v2595_v35 = vld [vmem:[%s2447_s12 + $0x68] sm:$0xff]  ;;  %v2598_v36 = vld [vmem:[%s2447_s12 + $0x60] sm:$0xff] }
  0x6a   : > { %v469_v37 = vld [vmem:[%s2427_s21 + $0x38] sm:$0xff]  ;;  %v1845_v38 = vadd.f32 -0.2, %v2592_v34  ;;  %v1844_v39 = vadd.f32 -0.2, %v2595_v35  ;;  %v468_v41 = vld [vmem:[%s2427_s21 + $0x30] sm:$0xff] }
  0x6b   : > { %480 = vmatpush.xpose.msra.mxu0 %v475_v13  ;;  %1923 = vmatpush.xpose.msra.mxu1 %v475_v13  ;;  %v1843_v40 = vadd.f32 -0.2, %v2598_v36  ;;  %v2606_v42 = vld [vmem:[%s2447_s12 + $0x78] sm:$0xff]  ;;  %v467_v43 = vld [vmem:[%s2427_s21 + $0x28] sm:$0xff]  ;;  %v466_v45 = vld [vmem:[%s2427_s21 + $0x20] sm:$0xff] }
  0x6c   : > { %1924 = vmatpush.xpose.msra.mxu2 %v475_v13  ;;  %1925 = vmatpush.xpose.msra.mxu3 %v475_v13  ;;  %v1846_v44 = vadd.f32 -0.2, %v2606_v42  ;;  %v465_v46 = vld [vmem:[%s2427_s21 + $0x18] sm:$0xff]  ;;  %v464_v47 = vld [vmem:[%s2427_s21 + $0x10] sm:$0xff]  ;;  %v463_v48 = vld [vmem:[%s2427_s21 + $0x8] sm:$0xff] }
  0x6d   : > { %610 = vperm.xlu2 %2082, %v1836_v14   ;;  %v462_v49 = vld [vmem:[%s2427_s21] sm:$0xff]  ;;  %v447_v54 = vld [vmem:[%s2442_s27 + $0x8] sm:$0xff]  ;;  %v448_v58 = vld [vmem:[%s2442_s27 + $0x10] sm:$0xff]  ;;  %s545_s21 = sadd.s32 128, %s2648_s1 }
  0x6e   : > { %600 = vperm.xlu1 %2081, %v1834_v15   ;;  %590 = vperm.xlu0 %2080, %v1832_v16   ;;  %v446_v50 = vld [vmem:[%s2442_s27] sm:$0xff]  ;;  %v451_v55 = vld [vmem:[%s2442_s27 + $0x28] sm:$0xff]  ;;  %v452_v59 = vld [vmem:[%s2442_s27 + $0x30] sm:$0xff]  ;;  %p546_p10 = scmp.lt.s32.totalorder %s2651_s28, %s545_s21 }
  0x6f   : > { %481 = vmatpush.xpose.msra.mxu0 %v474_v17  ;;  %1926 = vmatpush.xpose.msra.mxu1 %v474_v17  ;;  %v450_v51 = vld [vmem:[%s2442_s27 + $0x20] sm:$0xff]  ;;  %v455_v56 = vld [vmem:[%s2442_s27 + $0x48] sm:$0xff]  ;;  %v456_v60 = vld [vmem:[%s2442_s27 + $0x50] sm:$0xff] }
  0x70   : > { %1927 = vmatpush.xpose.msra.mxu2 %v474_v17  ;;  %1928 = vmatpush.xpose.msra.mxu3 %v474_v17  ;;  %v454_v52 = vld [vmem:[%s2442_s27 + $0x40] sm:$0xff]  ;;  %v459_v57 = vld [vmem:[%s2442_s27 + $0x68] sm:$0xff]  ;;  %v460_v61 = vld [vmem:[%s2442_s27 + $0x70] sm:$0xff]  ;;  %p2657_p12 = pnand %p548_p11, %p546_p10 }
  0x71   : > { %v458_v53 = vld [vmem:[%s2442_s27 + $0x60] sm:$0xff]  ;;  %v449_v62 = vld [vmem:[%s2442_s27 + $0x18] sm:$0xff] }
  0x72   : > { %v453_v63 = vld [vmem:[%s2442_s27 + $0x38] sm:$0xff] }
  0x73   : > { %482 = vmatpush.xpose.msra.mxu0 %v473_v21  ;;  %1929 = vmatpush.xpose.msra.mxu1 %v473_v21  ;;  %v457_v0 = vld [vmem:[%s2442_s27 + $0x58] sm:$0xff] }
  0x74   : > { %1930 = vmatpush.xpose.msra.mxu2 %v473_v21  ;;  %1931 = vmatpush.xpose.msra.mxu3 %v473_v21  ;;  %v461_v1 = vld [vmem:[%s2442_s27 + $0x78] sm:$0xff] }
  0x75   : > { %625 = vperm.xlu2 %2082, %v1839_v22  }
  0x76   : > { %620 = vperm.xlu1 %2081, %v1838_v23   ;;  %615 = vperm.xlu0 %2080, %v1837_v24  }
  0x77   : > { %483 = vmatpush.xpose.msra.mxu0 %v472_v25  ;;  %1932 = vmatpush.xpose.msra.mxu1 %v472_v25 }
  0x78   : > { %1933 = vmatpush.xpose.msra.mxu2 %v472_v25  ;;  %1934 = vmatpush.xpose.msra.mxu3 %v472_v25 }
  0x7b   : > { %484 = vmatpush.xpose.msra.mxu0 %v471_v29  ;;  %1935 = vmatpush.xpose.msra.mxu1 %v471_v29 }
  0x7c   : > { %1936 = vmatpush.xpose.msra.mxu2 %v471_v29  ;;  %1937 = vmatpush.xpose.msra.mxu3 %v471_v29 }
  0x7d   : > { %640 = vperm.xlu2 %2082, %v1842_v30  }
  0x7e   : > { %635 = vperm.xlu1 %2081, %v1841_v31   ;;  %630 = vperm.xlu0 %2080, %v1840_v32  }
  0x7f   : > { %485 = vmatpush.xpose.msra.mxu0 %v470_v33  ;;  %1938 = vmatpush.xpose.msra.mxu1 %v470_v33 }
  0x80   : > { %1939 = vmatpush.xpose.msra.mxu2 %v470_v33  ;;  %1940 = vmatpush.xpose.msra.mxu3 %v470_v33 }
  0x83   : > { %486 = vmatpush.xpose.msra.mxu0 %v469_v37  ;;  %1941 = vmatpush.xpose.msra.mxu1 %v469_v37 }
  0x84   : > { %1942 = vmatpush.xpose.msra.mxu2 %v469_v37  ;;  %1943 = vmatpush.xpose.msra.mxu3 %v469_v37 }
  0x85   : > { %655 = vperm.xlu2 %2082, %v1845_v38  }
  0x86   : > { %650 = vperm.xlu1 %2081, %v1844_v39   ;;  %645 = vperm.xlu0 %2080, %v1843_v40  }
  0x87   : > { %487 = vmatpush.xpose.msra.mxu0 %v468_v41  ;;  %1944 = vmatpush.xpose.msra.mxu1 %v468_v41 }
  0x88   : > { %1945 = vmatpush.xpose.msra.mxu2 %v468_v41  ;;  %1946 = vmatpush.xpose.msra.mxu3 %v468_v41 }
  0x8b   : > { %488 = vmatpush.xpose.msra.mxu0 %v467_v43  ;;  %1947 = vmatpush.xpose.msra.mxu1 %v467_v43 }
  0x8c   : > { %1948 = vmatpush.xpose.msra.mxu2 %v467_v43  ;;  %1949 = vmatpush.xpose.msra.mxu3 %v467_v43 }
  0x8d   : > { %702 = vperm.xlu2 %2082, %v2556_v12  }
  0x8e   : > { %697 = vperm.xlu1 %2081, %v2545_v6   ;;  %660 = vperm.xlu0 %2080, %v1846_v44  }
  0x8f   : > { %489 = vmatpush.xpose.msra.mxu0 %v466_v45  ;;  %1950 = vmatpush.xpose.msra.mxu1 %v466_v45 }
  0x90   : > { %1951 = vmatpush.xpose.msra.mxu2 %v466_v45  ;;  %1952 = vmatpush.xpose.msra.mxu3 %v466_v45 }
  0x93   : > { %490 = vmatpush.xpose.msra.mxu0 %v465_v46  ;;  %1953 = vmatpush.xpose.msra.mxu1 %v465_v46 }
  0x94   : > { %1954 = vmatpush.xpose.msra.mxu2 %v465_v46  ;;  %1955 = vmatpush.xpose.msra.mxu3 %v465_v46 }
  0x95   : > { %717 = vperm.xlu2 %2082, %v2537_v2  }
  0x96   : > { %712 = vperm.xlu1 %2081, %v2553_v11   ;;  %707 = vperm.xlu0 %2080, %v2540_v3  }
  0x97   : > { %491 = vmatpush.xpose.msra.mxu0 %v464_v47  ;;  %1956 = vmatpush.xpose.msra.mxu1 %v464_v47 }
  0x98   : > { %1957 = vmatpush.xpose.msra.mxu2 %v464_v47  ;;  %1958 = vmatpush.xpose.msra.mxu3 %v464_v47 }
  0x9b   : > { %492 = vmatpush.xpose.msra.mxu0 %v463_v48  ;;  %1959 = vmatpush.xpose.msra.mxu1 %v463_v48 }
  0x9c   : > { %1960 = vmatpush.xpose.msra.mxu2 %v463_v48  ;;  %1961 = vmatpush.xpose.msra.mxu3 %v463_v48 }
  0x9d   : > { %732 = vperm.xlu2 %2082, %v2567_v19  }
  0x9e   : > { %727 = vperm.xlu1 %2081, %v2570_v20   ;;  %722 = vperm.xlu0 %2080, %v2550_v10  }
  0x9f   : > { %493 = vmatpush.xpose.msra.mxu0 %v462_v49  ;;  %1962 = vmatpush.xpose.msra.mxu1 %v462_v49 }
  0xa0   : > { %1963 = vmatpush.xpose.msra.mxu2 %v462_v49  ;;  %1964 = vmatpush.xpose.msra.mxu3 %v462_v49 }
  0xa2   : > { %494 = vmatmul.f32.vlgmr.msra.gmra.mxu0 %v446_v50  ;;  %506 = vmatmul.f32.vlgmr.msra.gmra.mxu1 %v450_v51 }
  0xa3   : > { %518 = vmatmul.f32.vlgmr.msra.gmra.mxu2 %v454_v52  ;;  %530 = vmatmul.f32.vlgmr.msra.gmra.mxu3 %v458_v53 }
  0xa5   : > { %747 = vperm.xlu2 %2082, %v2581_v27  }
  0xa6   : > { %742 = vperm.xlu1 %2081, %v2584_v28   ;;  %737 = vperm.xlu0 %2080, %v2564_v18  }
  0xaa   : > { %497 = vmatmul.f32.gmra.mxu0 %v447_v54  ;;  %509 = vmatmul.f32.gmra.mxu1 %v451_v55 }
  0xab   : > { %521 = vmatmul.f32.gmra.mxu2 %v455_v56  ;;  %533 = vmatmul.f32.gmra.mxu3 %v459_v57 }
  0xad   : > { %762 = vperm.xlu2 %2082, %v2595_v35  }
  0xae   : > { %757 = vperm.xlu1 %2081, %v2598_v36   ;;  %752 = vperm.xlu0 %2080, %v2578_v26  }
  0xb2   : > { %500 = vmatmul.f32.gmra.mxu0 %v448_v58  ;;  %512 = vmatmul.f32.gmra.mxu1 %v452_v59 }
  0xb3   : > { %524 = vmatmul.f32.gmra.mxu2 %v456_v60  ;;  %536 = vmatmul.f32.gmra.mxu3 %v460_v61 }
  0xb6   : > { %772 = vperm.xlu1 %2081, %v2606_v42   ;;  %767 = vperm.xlu0 %2080, %v2592_v34  }
  0xba   : > { %503 = vmatmul.f32.gmra.mxu0 %v449_v62  ;;  %515 = vmatmul.f32.gmra.mxu1 %v453_v63 }
  0xbb   : > { %527 = vmatmul.f32.gmra.mxu2 %v457_v0  ;;  %539 = vmatmul.f32.gmra.mxu3 %v461_v1 }
  0xbf   : > { %v606_v2 = vpop.permute.xlu2 %605 }
  0xc7   : > { %v611_v5 = vpop.permute.xlu2 %610 }
  0xcf   : > { %v626_v8 = vpop.permute.xlu2 %625 }
  0xd7   : > { %v2669_v13 = vpop.permute.xlu2 %640 }
  0xd8   : > { %v2661_v3 = vpop.permute.xlu1 %595  ;;  %v586_v4 = vpop.permute.xlu0 %585 }
  0xdf   : > { %v2671_v16 = vpop.permute.xlu2 %655 }
  0xe0   : > { %v2663_v6 = vpop.permute.xlu1 %600  ;;  %v591_v7 = vpop.permute.xlu0 %590 }
  0xe7   : > { %v2677_v19 = vpop.permute.xlu2 %702 }
  0xe8   : > { %v2665_v9 = vpop.permute.xlu1 %620  ;;  %v616_v10 = vpop.permute.xlu0 %615 }
  0xef   : > { %v2683_v22 = vpop.permute.xlu2 %717 }
  0xf0   : > { %v2667_v11 = vpop.permute.xlu1 %635  ;;  %v631_v12 = vpop.permute.xlu0 %630 }
  0xf7   : > { %v2689_v25 = vpop.permute.xlu2 %732 }
  0xf8   : > { %v651_v14 = vpop.permute.xlu1 %650  ;;  %v646_v15 = vpop.permute.xlu0 %645 }
  0xff   : > { %v2709_v34 = vpop.permute.xlu2 %747 }
 0x100   : > { %v2673_v17 = vpop.permute.xlu1 %697  ;;  %v2675_v18 = vpop.permute.xlu0 %660 }
 0x107   : > { %v2743_v49 = vpop.permute.xlu2 %762 }
 0x108   : > { %v2679_v20 = vpop.permute.xlu1 %712  ;;  %v2681_v21 = vpop.permute.xlu0 %707 }
 0x110   : > { %v2685_v23 = vpop.permute.xlu1 %727  ;;  %v2687_v24 = vpop.permute.xlu0 %722 }
 0x118   : > { %v2691_v26 = vpop.permute.xlu1 %742  ;;  %v2703_v31 = vpop.permute.xlu0 %737 }
 0x11f   : > { %v2693_v27 = vpop.f32.mrf.mxu0  ;;  %v2695_v28 = vpop.f32.mrf.mxu1 }
 0x120   : > { %3837 = vst [vmem:[#allocation21_spill] sm:$0xff] %v2693_v27  ;;  %v663_v29 = vsub.f32 %v2693_v27, %v586_v4  ;;  %vm775_vm1 = vcmp.lt.f32.partialorder %v2693_v27, %v2673_v17  ;;  %v667_v30 = vsub.f32 %v2695_v28, %v606_v2  ;;  %vm3804_vm2 = vcmp.lt.f32.partialorder %v2695_v28, %v2683_v22  ;;  %v2711_v35 = vpop.permute.xlu1 %757  ;;  %v2741_v48 = vpop.permute.xlu0 %752 }
 0x122   : > { %v2705_v32 = vmax.f32 %v663_v29, 0.0  ;;  %v2707_v33 = vmax.f32 %v667_v30, 0.0 }
 0x124   : > { %3838 = vst [vmem:[#allocation22_spill] sm:$0xff] %v2705_v32 }
 0x125   : > { %3839 = vst [vmem:[#allocation23_spill] sm:$0xff] %v2707_v33 }
 0x126   : > { %v2713_v36 = vpop.f32.mrf.mxu2  ;;  %v2715_v37 = vpop.f32.mrf.mxu3 }
 0x127   : > { %v671_v38 = vsub.f32 %v2713_v36, %v626_v8  ;;  %v675_v39 = vsub.f32 %v2715_v37, %v646_v15  ;;  %v2723_v40 = vpop.f32.mrf.mxu0  ;;  %v2725_v41 = vpop.f32.mrf.mxu1 }
 0x128   : > { %3840 = vst [vmem:[#allocation24_spill] sm:$0xff] %v2723_v40  ;;  %v664_v42 = vsub.f32 %v2723_v40, %v591_v7  ;;  %vm776_vm5 = vcmp.lt.f32.partialorder %v2723_v40, %v2677_v19  ;;  %v668_v43 = vsub.f32 %v2725_v41, %v611_v5  ;;  %vm3803_vm6 = vcmp.lt.f32.partialorder %v2725_v41, %v2687_v24  ;;  %v2774_v62 = vpop.permute.xlu0 %767 }
 0x129   : > { %v2733_v44 = vmax.f32 %v671_v38, 0.0  ;;  %v2735_v45 = vmax.f32 %v675_v39, 0.0 }
 0x12a   : > { %v2737_v46 = vmax.f32 %v664_v42, 0.0  ;;  %v2739_v47 = vmax.f32 %v668_v43, 0.0 }
 0x12b   : > { %3841 = vst [vmem:[#allocation25_spill] sm:$0xff] %v2733_v44 }
 0x12c   : > { %3842 = vst [vmem:[#allocation26_spill] sm:$0xff] %v2737_v46 }
 0x12d   : > { %3843 = vst [vmem:[#allocation27_spill] sm:$0xff] %v2739_v47 }
 0x12e   : > { %v2745_v50 = vpop.f32.mrf.mxu2  ;;  %v2747_v51 = vpop.f32.mrf.mxu3 }
 0x12f   : > { %v672_v52 = vsub.f32 %v2745_v50, %v631_v12  ;;  %v676_v53 = vsub.f32 %v2747_v51, %v651_v14  ;;  %v2755_v54 = vpop.f32.mrf.mxu0  ;;  %v2757_v55 = vpop.f32.mrf.mxu1 }
 0x130   : > { %3844 = vst [vmem:[#allocation28_spill] sm:$0xff] %v2755_v54  ;;  %v665_v56 = vsub.f32 %v2755_v54, %v2661_v3  ;;  %vm777_vm9 = vcmp.lt.f32.partialorder %v2755_v54, %v2681_v21  ;;  %v669_v57 = vsub.f32 %v2757_v55, %v616_v10  ;;  %v2808_v14 = vpop.permute.xlu1 %772 }
 0x131   : > { %v2766_v58 = vmax.f32 %v672_v52, 0.0  ;;  %v2768_v59 = vmax.f32 %v676_v53, 0.0 }
 0x132   : > { %v2770_v60 = vmax.f32 %v665_v56, 0.0  ;;  %v2772_v61 = vmax.f32 %v669_v57, 0.0 }
 0x133   : > { %3845 = vst [vmem:[#allocation29_spill] sm:$0xff] %v2766_v58 }
 0x134   : > { %3846 = vst [vmem:[#allocation30_spill] sm:$0xff] %v2772_v61 }
 0x136   : > { %v2776_v63 = vpop.f32.mrf.mxu2  ;;  %v2778_v0 = vpop.f32.mrf.mxu3 }
 0x137   : > { %v673_v1 = vsub.f32 %v2776_v63, %v2667_v11  ;;  %v677_v2 = vsub.f32 %v2778_v0, %v2671_v16  ;;  %v2788_v3 = vpop.f32.mrf.mxu0  ;;  %v2790_v4 = vpop.f32.mrf.mxu1 }
 0x138   : > { %v666_v5 = vsub.f32 %v2788_v3, %v2663_v6  ;;  %vm778_vm13 = vcmp.lt.f32.partialorder %v2788_v3, %v2679_v20  ;;  %v670_v7 = vsub.f32 %v2790_v4, %v2665_v9 }
 0x139   : > { %v2800_v8 = vmax.f32 %v673_v1, 0.0  ;;  %v2802_v10 = vmax.f32 %v677_v2, 0.0 }
 0x13a   : > { %v2804_v11 = vmax.f32 %v666_v5, 0.0  ;;  %v2806_v12 = vmax.f32 %v670_v7, 0.0 }
 0x13c   : > { %3847 = vst [vmem:[#allocation31_spill] sm:$0xff] %v2804_v11 }
 0x13d   : > { %3848 = vst [vmem:[#allocation32_spill] sm:$0xff] %v2806_v12  ;;  %792 = sbr.rel (%p2657_p12) target bundleno = 531 (0x213), region = 48 }
 0x13e   : > { %v2810_v6 = vpop.f32.mrf.mxu2  ;;  %v2812_v15 = vpop.f32.mrf.mxu3 }
 0x13f   : > { %v674_v9 = vsub.f32 %v2810_v6, %v2669_v13  ;;  %v678_v16 = vsub.f32 %v2812_v15, %v2675_v18 }
 0x141   : > { %v2822_v29 = vmax.f32 %v674_v9, 0.0  ;;  %v2824_v30 = vmax.f32 %v678_v16, 0.0 }
 0x142   : > { %v793_v38 = vlaneseq  ;;  %v2829_v13 = vstv %s2648_s1  ;;  %v829_v39 = vstv %s2651_s28 }
 0x144   : > { %v2832_v42 = vshrl.u32 %v793_v38, 7  ;;  %v828_v43 = vand.u32 127, %v793_v38 }
 0x146   : > { %v2836_v18 = vadd.s32 %v2829_v13, %v2832_v42  ;;  %v2838_v52 = vadd.s32 %v829_v39, %v828_v43  ;;  %v796_v53 = vadd.s32 16, %v2832_v42  ;;  %v798_v56 = vadd.s32 32, %v2832_v42 }
 0x147   : > { %v797_v57 = vadd.s32 24, %v2832_v42  ;;  %v795_v1 = vadd.s32 8, %v2832_v42  ;;  %v799_v2 = vadd.s32 40, %v2832_v42 }
 0x148   : > { %vm831_vm0 = vcmp.ne.s32.totalorder %v2836_v18, %v2838_v52  ;;  %v2848_v5 = vadd.s32 %v2829_v13, %v796_v53  ;;  %v2851_v7 = vadd.s32 %v2829_v13, %v798_v56  ;;  %v800_v56 = vadd.s32 48, %v2832_v42 }
 0x149   : > { %v847_v9 = vsel %vm831_vm0, %v2705_v32, 0.0  ;;  %v2858_v16 = vadd.s32 %v2829_v13, %v795_v1  ;;  %v2865_v38 = vadd.s32 %v2829_v13, %v797_v57  ;;  %v2868_v39 = vadd.s32 %v2829_v13, %v799_v2 }
 0x14a   : > { %895 = vmax.xlane.f32.xlu0 %v847_v9  ;;  %vm833_vm12 = vcmp.ne.s32.totalorder %v2848_v5, %v2838_v52  ;;  %vm835_vm8 = vcmp.ne.s32.totalorder %v2851_v7, %v2838_v52  ;;  %v801_v57 = vadd.s32 56, %v2832_v42  ;;  %v802_v1 = vadd.s32 64, %v2832_v42 }
 0x14b   : > { %v849_v43 = vsel %vm833_vm12, %v2770_v60, 0.0  ;;  %v851_v53 = vsel %vm835_vm8, %v2707_v33, 0.0  ;;  %vm832_vm4 = vcmp.ne.s32.totalorder %v2858_v16, %v2838_v52  ;;  %vm834_vm15 = vcmp.ne.s32.totalorder %v2865_v38, %v2838_v52 }
 0x14c   : > { %899 = vmax.xlane.f32.xlu1 %v849_v43  ;;  %903 = vmax.xlane.f32.xlu2 %v851_v53  ;;  %vm836_vm11 = vcmp.ne.s32.totalorder %v2868_v39, %v2838_v52  ;;  %v848_v2 = vsel %vm832_vm4, %v2737_v46, 0.0  ;;  %v2892_v9 = vadd.s32 %v2829_v13, %v800_v56  ;;  %v850_v43 = vsel %vm834_vm15, %v2804_v11, 0.0 }
 0x14d   : > { %v852_v53 = vsel %vm836_vm11, %v2739_v47, 0.0  ;;  %v2903_v33 = vadd.s32 %v2829_v13, %v801_v57  ;;  %v2906_v32 = vadd.s32 %v2829_v13, %v802_v1  ;;  %v803_v56 = vadd.s32 72, %v2832_v42 }
 0x14e   : > { %vm3792_vm7 = vcmp.ne.s32.totalorder %v2892_v9, %v2838_v52  ;;  %v805_v57 = vadd.s32 88, %v2832_v42 }
 0x14f   : > { %vm3791_vm3 = vcmp.ne.s32.totalorder %v2903_v33, %v2838_v52  ;;  %vm3797_vm14 = vcmp.ne.s32.totalorder %v2906_v32, %v2838_v52  ;;  %v853_v1 = vsel %vm3792_vm7, %v2772_v61, 0.0 }
 0x150   : > { %v855_v47 = vsel %vm3797_vm14, %v2733_v44, 0.0  ;;  %v2934_v11 = vadd.s32 %v2829_v13, %v805_v57  ;;  %v807_v44 = vadd.s32 104, %v2832_v42 }
 0x152   : > { %897 = vmax.xlane.f32.xlu0 %v848_v2  ;;  %v804_v2 = vadd.s32 80, %v2832_v42  ;;  %vm3800_vm7 = vcmp.ne.s32.totalorder %v2934_v11, %v2838_v52  ;;  %v824_v61 = vadd.s32 %v2829_v13, %v807_v44 }
 0x154   : > { %901 = vmax.xlane.f32.xlu1 %v850_v43  ;;  %905 = vmax.xlane.f32.xlu2 %v852_v53  ;;  %v2922_v43 = vadd.s32 %v2829_v13, %v803_v56  ;;  %v854_v53 = vsel %vm3791_vm3, %v2806_v12, 0.0  ;;  %v821_v46 = vadd.s32 %v2829_v13, %v804_v2  ;;  %v806_v56 = vadd.s32 96, %v2832_v42 }
 0x155   : > { %vm3802_vm14 = vcmp.ne.s32.totalorder %v824_v61, %v2838_v52 }
 0x156   : > { %vm3796_vm10 = vcmp.ne.s32.totalorder %v2922_v43, %v2838_v52  ;;  %vm3798_vm3 = vcmp.ne.s32.totalorder %v821_v46, %v2838_v52  ;;  %v860_v44 = vsel %vm3802_vm14, %v2768_v59, 0.0  ;;  %vm864_vm14 = vmand %vm776_vm5, %vm832_vm4 }
 0x157   : > { %v856_v2 = vsel %vm3796_vm10, %v2766_v58, 0.0  ;;  %v857_v57 = vsel %vm3798_vm3, %v2800_v8, 0.0  ;;  %vm866_vm4 = vmand %vm778_vm13, %vm834_vm15  ;;  %vm3850_vm15 = vcmp.lt.f32.partialorder %v2757_v55, %v2685_v23 }
 0x15a   : > { %907 = vmax.xlane.f32.xlu0 %v853_v1  ;;  %v808_v1 = vadd.s32 112, %v2832_v42 }
 0x15c   : > { %909 = vmax.xlane.f32.xlu1 %v854_v53  ;;  %911 = vmax.xlane.f32.xlu2 %v855_v47  ;;  %v823_v47 = vadd.s32 %v2829_v13, %v806_v56  ;;  %v858_v53 = vsel %vm3800_vm7, %v2822_v29, 0.0  ;;  %v825_v12 = vadd.s32 %v2829_v13, %v808_v1  ;;  %v809_v56 = vadd.s32 120, %v2832_v42 }
 0x15e   : > { %vm3801_vm10 = vcmp.ne.s32.totalorder %v823_v47, %v2838_v52  ;;  %vm845_vm3 = vcmp.ne.s32.totalorder %v825_v12, %v2838_v52 }
 0x15f   : > { %v859_v58 = vsel %vm3801_vm10, %v2735_v45, 0.0  ;;  %v861_v1 = vsel %vm845_vm3, %v2802_v10, 0.0  ;;  %vm863_vm10 = vmand %vm775_vm1, %vm831_vm0 }
 0x160   : > { %vm865_vm0 = vmand %vm777_vm9, %vm833_vm12 }
 0x161   : > { %vm868_vm12 = vmand %vm3803_vm6, %vm836_vm11  ;;  %vm3853_vm11 = vcmp.ne.s32.totalorder %v2906_v32, %v2838_v52  ;;  %vm3854_vm6 = vcmp.lt.f32.partialorder %v2713_v36, %v2703_v31 }
 0x162   : > { %913 = vmax.xlane.f32.xlu0 %v856_v2  ;;  %v826_v2 = vadd.s32 %v2829_v13, %v809_v56  ;;  %v2274_v13 = vmov 0.0   ;;  %v881_v56 = vld [vmem:[%s2457_s29 + $0x10] sm:$0xff] }
 0x163   : > { %v1847_v42 = vsel %vm863_vm10, 1.0, %v2274_v13  ;;  %vm867_vm10 = vmand %vm3804_vm2, %vm835_vm8  ;;  %v1849_v18 = vsel %vm865_vm0, 1.0, %v2274_v13  ;;  %v1850_v5 = vsel %vm866_vm4, 1.0, %v2274_v13  ;;  %vm3851_vm0 = vcmp.ne.s32.totalorder %v2903_v33, %v2838_v52 }
 0x164   : > { %915 = vmax.xlane.f32.xlu1 %v857_v57  ;;  %917 = vmax.xlane.f32.xlu2 %v858_v53  ;;  %vm846_vm7 = vcmp.ne.s32.totalorder %v826_v2, %v2838_v52  ;;  %v1848_v57 = vsel %vm864_vm14, 1.0, %v2274_v13  ;;  %v1851_v16 = vsel %vm867_vm10, 1.0, %v2274_v13  ;;  %vm3849_vm14 = vcmp.ne.s32.totalorder %v2892_v9, %v2838_v52  ;;  %v879_v53 = vld [vmem:[%s2457_s29] sm:$0xff] }
 0x165   : > { %vm869_vm8 = vmand %vm3850_vm15, %vm3849_vm14  ;;  %vm3852_vm4 = vcmp.lt.f32.partialorder %v2790_v4, %v2689_v25  ;;  %v1852_v7 = vsel %vm868_vm12, 1.0, %v2274_v13  ;;  %vm3855_vm15 = vcmp.ne.s32.totalorder %v2922_v43, %v2838_v52  ;;  %vm3856_vm2 = vcmp.lt.f32.partialorder %v2745_v50, %v2691_v26 }
 0x166   : > { %vm870_vm10 = vmand %vm3852_vm4, %vm3851_vm0  ;;  %v1853_v38 = vsel %vm869_vm8, 1.0, %v2274_v13  ;;  %vm3857_vm12 = vcmp.ne.s32.totalorder %v821_v46, %v2838_v52  ;;  %vm3858_vm8 = vcmp.lt.f32.partialorder %v2776_v63, %v2709_v34 }
 0x167   : > { %v1854_v39 = vsel %vm870_vm10, 1.0, %v2274_v13  ;;  %vm871_vm14 = vmand %vm3854_vm6, %vm3853_vm11  ;;  %vm3859_vm6 = vcmp.ne.s32.totalorder %v2934_v11, %v2838_v52  ;;  %vm3860_vm10 = vcmp.lt.f32.partialorder %v2810_v6, %v2741_v48  ;;  %vm3861_vm11 = vcmp.ne.s32.totalorder %v823_v47, %v2838_v52 }
 0x168   : > { %vm872_vm0 = vmand %vm3856_vm2, %vm3855_vm15  ;;  %v1855_v33 = vsel %vm871_vm14, 1.0, %v2274_v13  ;;  %vm3862_vm15 = vcmp.lt.f32.partialorder %v2715_v37, %v2711_v35  ;;  %vm3863_vm14 = vcmp.ne.s32.totalorder %v824_v61, %v2838_v52 }
 0x169   : > { %vm873_vm4 = vmand %vm3858_vm8, %vm3857_vm12  ;;  %v1856_v9 = vsel %vm872_vm0, 1.0, %v2274_v13  ;;  %vm3864_vm0 = vcmp.lt.f32.partialorder %v2747_v51, %v2743_v49 }
 0x16a   : > { %919 = vmax.xlane.f32.xlu0 %v859_v58  ;;  %v862_v58 = vsel %vm846_vm7, %v2824_v30, 0.0  ;;  %v1857_v32 = vsel %vm873_vm4, 1.0, %v2274_v13  ;;  %vm874_vm2 = vmand %vm3860_vm10, %vm3859_vm6  ;;  %vm3865_vm4 = vcmp.lt.f32.partialorder %v2778_v0, %v2774_v62  ;;  %vm3866_vm10 = vcmp.lt.f32.partialorder %v2812_v15, %v2808_v14 }
 0x16b   : > { %vm875_vm12 = vmand %vm3862_vm15, %vm3861_vm11  ;;  %v1858_v46 = vsel %vm874_vm2, 1.0, %v2274_v13  ;;  %vm943_vm2 = vcmask 7168  }
 0x16c   : > { %921 = vmax.xlane.f32.xlu1 %v860_v44  ;;  %923 = vmax.xlane.f32.xlu2 %v861_v1  ;;  %vm876_vm8 = vmand %vm3864_vm0, %vm3863_vm14  ;;  %v1859_v11 = vsel %vm875_vm12, 1.0, %v2274_v13  ;;  %v883_v44 = vld [vmem:[%s2457_s29 + $0x20] sm:$0xff] }
 0x16d   : > { %v1860_v43 = vsel %vm876_vm8, 1.0, %v2274_v13  ;;  %vm877_vm6 = vmand %vm3865_vm4, %vm845_vm3 }
 0x16e   : > { %vm878_vm11 = vmand %vm3866_vm10, %vm846_vm7  ;;  %v1861_v61 = vsel %vm877_vm6, 1.0, %v2274_v13 }
 0x16f   : > { %v1862_v47 = vsel %vm878_vm11, 1.0, %v2274_v13 }
 0x172   : > { %925 = vmax.xlane.f32.xlu0 %v862_v58 }
 0x174   : > { %1008 = vadd.xlane.f32.xlu1 %v1847_v42  ;;  %1010 = vadd.xlane.f32.xlu2 %v1848_v57  ;;  %v880_v42 = vld [vmem:[%s2457_s29 + $0x8] sm:$0xff]  ;;  %v882_v57 = vld [vmem:[%s2457_s29 + $0x18] sm:$0xff] }
 0x17a   : > { %1012 = vadd.xlane.f32.xlu0 %v1849_v18 }
 0x17c   : > { %1014 = vadd.xlane.f32.xlu1 %v1850_v5  ;;  %1016 = vadd.xlane.f32.xlu2 %v1851_v16  ;;  %v884_v5 = vld [vmem:[%s2457_s29 + $0x28] sm:$0xff] }
 0x182   : > { %1018 = vadd.xlane.f32.xlu0 %v1852_v7 }
 0x184   : > { %1020 = vadd.xlane.f32.xlu1 %v1853_v38  ;;  %1022 = vadd.xlane.f32.xlu2 %v1854_v39 }
 0x18a   : > { %1024 = vadd.xlane.f32.xlu0 %v1855_v33 }
 0x18c   : > { %1026 = vadd.xlane.f32.xlu1 %v1856_v9  ;;  %1028 = vadd.xlane.f32.xlu2 %v1857_v32  ;;  %v885_v9 = vld [vmem:[%s2457_s29 + $0x30] sm:$0xff]  ;;  %v886_v32 = vld [vmem:[%s2457_s29 + $0x38] sm:$0xff] }
 0x192   : > { %1030 = vadd.xlane.f32.xlu0 %v1858_v46 }
 0x194   : > { %1032 = vadd.xlane.f32.xlu1 %v1859_v11  ;;  %1034 = vadd.xlane.f32.xlu2 %v1860_v43  ;;  %v887_v11 = vld [vmem:[%s2457_s29 + $0x40] sm:$0xff] }
 0x19a   : > { %1036 = vadd.xlane.f32.xlu0 %v1861_v61 }
 0x19c   : > { %1038 = vadd.xlane.f32.xlu1 %v1862_v47 }
 0x1bd   : > { %v896_v12 = vpop.xlane.xlu0 %895 }
 0x1be   : > { %v927_v1 = vmax.f32 %v879_v53, %v896_v12 }
 0x1bf   : > { %v900_v52 = vpop.xlane.xlu1 %899  ;;  %v904_v2 = vpop.xlane.xlu2 %903 }
 0x1c0   : > { %944 = vst.msk [vmem:[%s2457_s29] sm:$0xff] %vm943_vm2, %v927_v1  ;;  %v929_v58 = vmax.f32 %v881_v56, %v900_v52  ;;  %v931_v13 = vmax.f32 %v883_v44, %v904_v2  ;;  %v888_v56 = vld [vmem:[%s2457_s29 + $0x48] sm:$0xff]  ;;  %v889_v44 = vld [vmem:[%s2457_s29 + $0x50] sm:$0xff]  ;;  %v890_v52 = vld [vmem:[%s2457_s29 + $0x58] sm:$0xff] }
 0x1c2   : > { %946 = vst.msk [vmem:[%s2457_s29 + $0x10] sm:$0xff] %vm943_vm2, %v929_v58 }
 0x1c3   : > { %948 = vst.msk [vmem:[%s2457_s29 + $0x20] sm:$0xff] %vm943_vm2, %v931_v13 }
 0x1c5   : > { %v898_v18 = vpop.xlane.xlu0 %897 }
 0x1c6   : > { %v928_v16 = vmax.f32 %v880_v42, %v898_v18  ;;  %v891_v18 = vld [vmem:[%s2457_s29 + $0x60] sm:$0xff] }
 0x1c7   : > { %v902_v7 = vpop.xlane.xlu1 %901  ;;  %v906_v38 = vpop.xlane.xlu2 %905 }
 0x1c8   : > { %v930_v39 = vmax.f32 %v882_v57, %v902_v7  ;;  %945 = vst.msk [vmem:[%s2457_s29 + $0x8] sm:$0xff] %vm943_vm2, %v928_v16  ;;  %v932_v33 = vmax.f32 %v884_v5, %v906_v38  ;;  %v892_v5 = vld [vmem:[%s2457_s29 + $0x68] sm:$0xff]  ;;  %v893_v7 = vld [vmem:[%s2457_s29 + $0x70] sm:$0xff] }
 0x1ca   : > { %947 = vst.msk [vmem:[%s2457_s29 + $0x18] sm:$0xff] %vm943_vm2, %v930_v39 }
 0x1cb   : > { %949 = vst.msk [vmem:[%s2457_s29 + $0x28] sm:$0xff] %vm943_vm2, %v932_v33 }
 0x1cd   : > { %v908_v46 = vpop.xlane.xlu0 %907 }
 0x1ce   : > { %v933_v43 = vmax.f32 %v885_v9, %v908_v46  ;;  %v894_v46 = vld [vmem:[%s2457_s29 + $0x78] sm:$0xff] }
 0x1cf   : > { %v910_v61 = vpop.xlane.xlu1 %909  ;;  %v912_v47 = vpop.xlane.xlu2 %911 }
 0x1d0   : > { %v934_v53 = vmax.f32 %v886_v32, %v910_v61  ;;  %950 = vst.msk [vmem:[%s2457_s29 + $0x30] sm:$0xff] %vm943_vm2, %v933_v43  ;;  %v935_v12 = vmax.f32 %v887_v11, %v912_v47  ;;  %v960_v11 = vld [vmem:[%s2462_s18] sm:$0xff]  ;;  %v961_v61 = vld [vmem:[%s2462_s18 + $0x8] sm:$0xff] }
 0x1d2   : > { %951 = vst.msk [vmem:[%s2457_s29 + $0x38] sm:$0xff] %vm943_vm2, %v934_v53 }
 0x1d3   : > { %952 = vst.msk [vmem:[%s2457_s29 + $0x40] sm:$0xff] %vm943_vm2, %v935_v12 }
 0x1d5   : > { %v914_v1 = vpop.xlane.xlu0 %913 }
 0x1d6   : > { %v936_v2 = vmax.f32 %v888_v56, %v914_v1  ;;  %v962_v1 = vld [vmem:[%s2462_s18 + $0x10] sm:$0xff] }
 0x1d7   : > { %v916_v58 = vpop.xlane.xlu1 %915  ;;  %v918_v13 = vpop.xlane.xlu2 %917 }
 0x1d8   : > { %v937_v42 = vmax.f32 %v889_v44, %v916_v58  ;;  %953 = vst.msk [vmem:[%s2457_s29 + $0x48] sm:$0xff] %vm943_vm2, %v936_v2  ;;  %v938_v57 = vmax.f32 %v890_v52, %v918_v13  ;;  %v963_v52 = vld [vmem:[%s2462_s18 + $0x18] sm:$0xff]  ;;  %v964_v58 = vld [vmem:[%s2462_s18 + $0x20] sm:$0xff] }
 0x1da   : > { %954 = vst.msk [vmem:[%s2457_s29 + $0x50] sm:$0xff] %vm943_vm2, %v937_v42 }
 0x1db   : > { %955 = vst.msk [vmem:[%s2457_s29 + $0x58] sm:$0xff] %vm943_vm2, %v938_v57 }
 0x1dd   : > { %v920_v16 = vpop.xlane.xlu0 %919 }
 0x1de   : > { %v939_v38 = vmax.f32 %v891_v18, %v920_v16  ;;  %v965_v16 = vld [vmem:[%s2462_s18 + $0x28] sm:$0xff] }
 0x1df   : > { %v922_v39 = vpop.xlane.xlu1 %921  ;;  %v924_v33 = vpop.xlane.xlu2 %923 }
 0x1e0   : > { %v940_v9 = vmax.f32 %v892_v5, %v922_v39  ;;  %956 = vst.msk [vmem:[%s2457_s29 + $0x60] sm:$0xff] %vm943_vm2, %v939_v38  ;;  %v941_v32 = vmax.f32 %v893_v7, %v924_v33  ;;  %v966_v7 = vld [vmem:[%s2462_s18 + $0x30] sm:$0xff]  ;;  %v967_v39 = vld [vmem:[%s2462_s18 + $0x38] sm:$0xff] }
 0x1e2   : > { %957 = vst.msk [vmem:[%s2457_s29 + $0x68] sm:$0xff] %vm943_vm2, %v940_v9 }
 0x1e3   : > { %958 = vst.msk [vmem:[%s2457_s29 + $0x70] sm:$0xff] %vm943_vm2, %v941_v32 }
 0x1e5   : > { %v926_v43 = vpop.xlane.xlu0 %925 }
 0x1e6   : > { %v942_v47 = vmax.f32 %v894_v46, %v926_v43  ;;  %v968_v43 = vld [vmem:[%s2462_s18 + $0x40] sm:$0xff] }
 0x1e7   : > { %v1009_v53 = vpop.xlane.xlu1 %1008  ;;  %v1011_v12 = vpop.xlane.xlu2 %1010 }
 0x1e8   : > { %v1040_v56 = vadd.f32 %v1009_v53, %v960_v11  ;;  %959 = vst.msk [vmem:[%s2457_s29 + $0x78] sm:$0xff] %vm943_vm2, %v942_v47  ;;  %v1041_v44 = vadd.f32 %v1011_v12, %v961_v61  ;;  %v969_v61 = vld [vmem:[%s2462_s18 + $0x48] sm:$0xff]  ;;  %v970_v53 = vld [vmem:[%s2462_s18 + $0x50] sm:$0xff] }
 0x1ea   : > { %1056 = vst.msk [vmem:[%s2462_s18] sm:$0xff] %vm943_vm2, %v1040_v56 }
 0x1eb   : > { %1057 = vst.msk [vmem:[%s2462_s18 + $0x8] sm:$0xff] %vm943_vm2, %v1041_v44 }
 0x1ed   : > { %v1013_v2 = vpop.xlane.xlu0 %1012 }
 0x1ee   : > { %v1042_v13 = vadd.f32 %v1013_v2, %v962_v1  ;;  %v971_v2 = vld [vmem:[%s2462_s18 + $0x58] sm:$0xff] }
 0x1ef   : > { %v1015_v42 = vpop.xlane.xlu1 %1014  ;;  %v1017_v57 = vpop.xlane.xlu2 %1016 }
 0x1f0   : > { %v1043_v18 = vadd.f32 %v1015_v42, %v963_v52  ;;  %1058 = vst.msk [vmem:[%s2462_s18 + $0x10] sm:$0xff] %vm943_vm2, %v1042_v13  ;;  %v1044_v5 = vadd.f32 %v1017_v57, %v964_v58  ;;  %v972_v58 = vld [vmem:[%s2462_s18 + $0x60] sm:$0xff]  ;;  %v973_v42 = vld [vmem:[%s2462_s18 + $0x68] sm:$0xff] }
 0x1f2   : > { %1059 = vst.msk [vmem:[%s2462_s18 + $0x18] sm:$0xff] %vm943_vm2, %v1043_v18 }
 0x1f3   : > { %1060 = vst.msk [vmem:[%s2462_s18 + $0x20] sm:$0xff] %vm943_vm2, %v1044_v5 }
 0x1f5   : > { %v1019_v38 = vpop.xlane.xlu0 %1018 }
 0x1f6   : > { %v1045_v33 = vadd.f32 %v1019_v38, %v965_v16  ;;  %v974_v38 = vld [vmem:[%s2462_s18 + $0x70] sm:$0xff] }
 0x1f7   : > { %v1021_v9 = vpop.xlane.xlu1 %1020  ;;  %v1023_v32 = vpop.xlane.xlu2 %1022 }
 0x1f8   : > { %v1046_v46 = vadd.f32 %v1021_v9, %v966_v7  ;;  %1061 = vst.msk [vmem:[%s2462_s18 + $0x28] sm:$0xff] %vm943_vm2, %v1045_v33  ;;  %v1047_v11 = vadd.f32 %v1023_v32, %v967_v39  ;;  %v975_v39 = vld [vmem:[%s2462_s18 + $0x78] sm:$0xff] }
 0x1fa   : > { %1062 = vst.msk [vmem:[%s2462_s18 + $0x30] sm:$0xff] %vm943_vm2, %v1046_v46 }
 0x1fb   : > { %1063 = vst.msk [vmem:[%s2462_s18 + $0x38] sm:$0xff] %vm943_vm2, %v1047_v11 }
 0x1fd   : > { %v1025_v47 = vpop.xlane.xlu0 %1024 }
 0x1fe   : > { %v1048_v12 = vadd.f32 %v1025_v47, %v968_v43 }
 0x1ff   : > { %v1027_v56 = vpop.xlane.xlu1 %1026  ;;  %v1029_v44 = vpop.xlane.xlu2 %1028 }
 0x200   : > { %v1049_v1 = vadd.f32 %v1027_v56, %v969_v61  ;;  %1064 = vst.msk [vmem:[%s2462_s18 + $0x40] sm:$0xff] %vm943_vm2, %v1048_v12  ;;  %v1050_v52 = vadd.f32 %v1029_v44, %v970_v53 }
 0x202   : > { %1065 = vst.msk [vmem:[%s2462_s18 + $0x48] sm:$0xff] %vm943_vm2, %v1049_v1 }
 0x203   : > { %1066 = vst.msk [vmem:[%s2462_s18 + $0x50] sm:$0xff] %vm943_vm2, %v1050_v52 }
 0x205   : > { %v1031_v13 = vpop.xlane.xlu0 %1030 }
 0x206   : > { %v1051_v57 = vadd.f32 %v1031_v13, %v971_v2 }
 0x207   : > { %v1033_v18 = vpop.xlane.xlu1 %1032  ;;  %v1035_v5 = vpop.xlane.xlu2 %1034 }
 0x208   : > { %v1052_v16 = vadd.f32 %v1033_v18, %v972_v58  ;;  %1067 = vst.msk [vmem:[%s2462_s18 + $0x58] sm:$0xff] %vm943_vm2, %v1051_v57  ;;  %v1053_v7 = vadd.f32 %v1035_v5, %v973_v42 }
 0x20a   : > { %1068 = vst.msk [vmem:[%s2462_s18 + $0x60] sm:$0xff] %vm943_vm2, %v1052_v16 }
 0x20b   : > { %1069 = vst.msk [vmem:[%s2462_s18 + $0x68] sm:$0xff] %vm943_vm2, %v1053_v7 }
 0x20d   : > { %v1037_v33 = vpop.xlane.xlu0 %1036 }
 0x20e   : > { %v1054_v9 = vadd.f32 %v1037_v33, %v974_v38 }
 0x20f   : > { %v1039_v32 = vpop.xlane.xlu1 %1038 }
 0x210   : > { %v1055_v46 = vadd.f32 %v1039_v32, %v975_v39  ;;  %1070 = vst.msk [vmem:[%s2462_s18 + $0x70] sm:$0xff] %vm943_vm2, %v1054_v9 }
 0x212   : > { %1071 = vst.msk [vmem:[%s2462_s18 + $0x78] sm:$0xff] %vm943_vm2, %v1055_v46 }
 0x213 PF: > { %1074 = sbr.rel (!%p2657_p12) target bundleno = 731 (0x2db), region = 52  ;;  %1095 = vmax.xlane.f32.xlu1 (%p2657_p12), %v2770_v60  ;;  %v3867_v11 = vld [vmem:[#allocation22_spill] sm:$0xff] (%p2657_p12)  ;;  %v3868_v43 = vld [vmem:[#allocation23_spill] sm:$0xff] (%p2657_p12)  ;;  %v3874_v44 = vld [vmem:[#allocation25_spill] sm:$0xff] (%p2657_p12)  ;;  %v2275_v60 = vmov (%p2657_p12), 0.0   ;;  %vm3876_vm3 = vcmp.lt.f32.partialorder (%p2657_p12), %v2695_v28, %v2683_v22  ;;  %vm3879_vm7 = vcmp.lt.f32.partialorder (%p2657_p12), %v2790_v4, %v2689_v25  ;;  %vm3882_vm15 = vcmp.lt.f32.partialorder (%p2657_p12), %v2776_v63, %v2709_v34 }
 0x214   : > { %1091 = vmax.xlane.f32.xlu0 (%p2657_p12), %v3867_v11  ;;  %1099 = vmax.xlane.f32.xlu2 (%p2657_p12), %v3868_v43  ;;  %v3869_v61 = vld [vmem:[#allocation31_spill] sm:$0xff] (%p2657_p12)  ;;  %v3870_v47 = vld [vmem:[#allocation26_spill] sm:$0xff] (%p2657_p12)  ;;  %v3875_v1 = vld [vmem:[#allocation29_spill] sm:$0xff] (%p2657_p12)  ;;  %v1863_v52 = vsel (%p2657_p12), %vm775_vm1, 1.0, %v2275_v60  ;;  %v1864_v2 = vsel (%p2657_p12), %vm776_vm5, 1.0, %v2275_v60  ;;  %v1867_v17 = vsel (%p2657_p12), %vm3876_vm3, 1.0, %v2275_v60  ;;  %vm3877_vm1 = vcmp.lt.f32.partialorder (%p2657_p12), %v2725_v41, %v2687_v24 }
 0x215   : > { %v3871_v53 = vld [vmem:[#allocation27_spill] sm:$0xff] (%p2657_p12)  ;;  %v3872_v12 = vld [vmem:[#allocation32_spill] sm:$0xff] (%p2657_p12)  ;;  %v3873_v56 = vld [vmem:[#allocation30_spill] sm:$0xff] (%p2657_p12)  ;;  %v1868_v19 = vsel (%p2657_p12), %vm3877_vm1, 1.0, %v2275_v60  ;;  %vm3878_vm5 = vcmp.lt.f32.partialorder (%p2657_p12), %v2757_v55, %v2685_v23  ;;  %v1870_v20 = vsel (%p2657_p12), %vm3879_vm7, 1.0, %v2275_v60  ;;  %v1873_v23 = vsel (%p2657_p12), %vm3882_vm15, 1.0, %v2275_v60 }
 0x216   : > { %v1869_v21 = vsel (%p2657_p12), %vm3878_vm5, 1.0, %v2275_v60  ;;  %vm3883_vm12 = vcmp.lt.f32.partialorder (%p2657_p12), %v2810_v6, %v2741_v48  ;;  %vm3884_vm14 = vcmp.lt.f32.partialorder (%p2657_p12), %v2715_v37, %v2711_v35  ;;  %vm3885_vm0 = vcmp.lt.f32.partialorder (%p2657_p12), %v2747_v51, %v2743_v49  ;;  %v1077_v35 = vld [vmem:[%s2457_s29 + $0x10] sm:$0xff] (%p2657_p12)  ;;  %v1075_v49 = vld [vmem:[%s2457_s29] sm:$0xff] (%p2657_p12)  ;;  %v1078_v13 = vld [vmem:[%s2457_s29 + $0x18] sm:$0xff] (%p2657_p12) }
 0x217   : > { %v1874_v25 = vsel (%p2657_p12), %vm3883_vm12, 1.0, %v2275_v60  ;;  %vm3886_vm8 = vcmp.lt.f32.partialorder (%p2657_p12), %v2778_v0, %v2774_v62  ;;  %vm3887_vm4 = vcmp.lt.f32.partialorder (%p2657_p12), %v2812_v15, %v2808_v14  ;;  %vm1139_vm6 = vcmask (%p2657_p12), 7168   ;;  %v1076_v42 = vld [vmem:[%s2457_s29 + $0x8] sm:$0xff] (%p2657_p12)  ;;  %v1082_v33 = vld [vmem:[%s2457_s29 + $0x38] sm:$0xff] (%p2657_p12)  ;;  %v1081_v9 = vld [vmem:[%s2457_s29 + $0x30] sm:$0xff] (%p2657_p12) }
 0x218   : > { %v1877_v34 = vsel %vm3886_vm8, 1.0, %v2275_v60  ;;  %v1878_v48 = vsel %vm3887_vm4, 1.0, %v2275_v60  ;;  %v1080_v57 = vld [vmem:[%s2457_s29 + $0x28] sm:$0xff]  ;;  %v1083_v32 = vld [vmem:[%s2457_s29 + $0x40] sm:$0xff] }
 0x21b   : > { %1097 = vmax.xlane.f32.xlu1 %v3869_v61 }
 0x21c   : > { %1093 = vmax.xlane.f32.xlu0 %v3870_v47  ;;  %1101 = vmax.xlane.f32.xlu2 %v3871_v53 }
 0x223   : > { %1105 = vmax.xlane.f32.xlu1 %v3872_v12  ;;  %v1085_v12 = vld [vmem:[%s2457_s29 + $0x50] sm:$0xff] }
 0x224   : > { %1103 = vmax.xlane.f32.xlu0 %v3873_v56  ;;  %1107 = vmax.xlane.f32.xlu2 %v3874_v44  ;;  %v1084_v56 = vld [vmem:[%s2457_s29 + $0x48] sm:$0xff]  ;;  %v1086_v44 = vld [vmem:[%s2457_s29 + $0x58] sm:$0xff] }
 0x22b   : > { %1111 = vmax.xlane.f32.xlu1 %v2800_v8  ;;  %v1079_v8 = vld [vmem:[%s2457_s29 + $0x20] sm:$0xff] }
 0x22c   : > { %1109 = vmax.xlane.f32.xlu0 %v3875_v1  ;;  %1113 = vmax.xlane.f32.xlu2 %v2822_v29 }
 0x233   : > { %1117 = vmax.xlane.f32.xlu1 %v2768_v59  ;;  %v1865_v59 = vsel %vm777_vm9, 1.0, %v2275_v60  ;;  %vm3880_vm9 = vcmp.lt.f32.partialorder %v2713_v36, %v2703_v31  ;;  %v1875_v31 = vsel %vm3884_vm14, 1.0, %v2275_v60 }
 0x234   : > { %1115 = vmax.xlane.f32.xlu0 %v2735_v45  ;;  %1119 = vmax.xlane.f32.xlu2 %v2802_v10  ;;  %v1866_v45 = vsel %vm778_vm13, 1.0, %v2275_v60  ;;  %v1871_v22 = vsel %vm3880_vm9, 1.0, %v2275_v60  ;;  %vm3881_vm13 = vcmp.lt.f32.partialorder %v2745_v50, %v2691_v26  ;;  %v1876_v26 = vsel %vm3885_vm0, 1.0, %v2275_v60 }
 0x235   : > { %v1872_v24 = vsel %vm3881_vm13, 1.0, %v2275_v60 }
 0x23b   : > { %1204 = vadd.xlane.f32.xlu1 %v1863_v52 }
 0x23c   : > { %1121 = vmax.xlane.f32.xlu0 %v2824_v30  ;;  %1206 = vadd.xlane.f32.xlu2 %v1864_v2 }
 0x243   : > { %1210 = vadd.xlane.f32.xlu1 %v1866_v45 }
 0x244   : > { %1208 = vadd.xlane.f32.xlu0 %v1865_v59  ;;  %1212 = vadd.xlane.f32.xlu2 %v1867_v17  ;;  %v1088_v17 = vld [vmem:[%s2457_s29 + $0x68] sm:$0xff] }
 0x24b   : > { %1216 = vadd.xlane.f32.xlu1 %v1869_v21  ;;  %v1089_v21 = vld [vmem:[%s2457_s29 + $0x70] sm:$0xff] }
 0x24c   : > { %1214 = vadd.xlane.f32.xlu0 %v1868_v19  ;;  %1218 = vadd.xlane.f32.xlu2 %v1870_v20  ;;  %v1087_v19 = vld [vmem:[%s2457_s29 + $0x60] sm:$0xff] }
 0x253   : > { %1222 = vadd.xlane.f32.xlu1 %v1872_v24 }
 0x254   : > { %1220 = vadd.xlane.f32.xlu0 %v1871_v22  ;;  %1224 = vadd.xlane.f32.xlu2 %v1873_v23 }
 0x25b   : > { %1228 = vadd.xlane.f32.xlu1 %v1875_v31 }
 0x25c   : > { %1226 = vadd.xlane.f32.xlu0 %v1874_v25  ;;  %1230 = vadd.xlane.f32.xlu2 %v1876_v26  ;;  %v1090_v26 = vld [vmem:[%s2457_s29 + $0x78] sm:$0xff] }
 0x263   : > { %1234 = vadd.xlane.f32.xlu1 %v1878_v48  ;;  %v1157_v48 = vld [vmem:[%s2462_s18 + $0x8] sm:$0xff] }
 0x264   : > { %1232 = vadd.xlane.f32.xlu0 %v1877_v34  ;;  %v1156_v34 = vld [vmem:[%s2462_s18] sm:$0xff] }
 0x286   : > { %v1096_v10 = vpop.xlane.xlu1 %1095 }
 0x287   : > { %v1092_v29 = vpop.xlane.xlu0 %1091  ;;  %v1125_v30 = vmax.f32 %v1077_v35, %v1096_v10  ;;  %v1100_v58 = vpop.xlane.xlu2 %1099 }
 0x288   : > { %v1123_v62 = vmax.f32 %v1075_v49, %v1092_v29  ;;  %v1127_v14 = vmax.f32 %v1079_v8, %v1100_v58  ;;  %v1159_v58 = vld [vmem:[%s2462_s18 + $0x18] sm:$0xff] }
 0x289   : > { %1142 = vst.msk [vmem:[%s2457_s29 + $0x10] sm:$0xff] %vm1139_vm6, %v1125_v30 }
 0x28a   : > { %1140 = vst.msk [vmem:[%s2457_s29] sm:$0xff] %vm1139_vm6, %v1123_v62  ;;  %v1158_v62 = vld [vmem:[%s2462_s18 + $0x10] sm:$0xff] }
 0x28b   : > { %1144 = vst.msk [vmem:[%s2457_s29 + $0x20] sm:$0xff] %vm1139_vm6, %v1127_v14  ;;  %v1160_v14 = vld [vmem:[%s2462_s18 + $0x20] sm:$0xff] }
 0x28e   : > { %v1098_v18 = vpop.xlane.xlu1 %1097 }
 0x28f   : > { %v1094_v5 = vpop.xlane.xlu0 %1093  ;;  %v1126_v16 = vmax.f32 %v1078_v13, %v1098_v18  ;;  %v1102_v38 = vpop.xlane.xlu2 %1101 }
 0x290   : > { %v1124_v7 = vmax.f32 %v1076_v42, %v1094_v5  ;;  %v1128_v39 = vmax.f32 %v1080_v57, %v1102_v38  ;;  %v1162_v38 = vld [vmem:[%s2462_s18 + $0x30] sm:$0xff] }
 0x291   : > { %1143 = vst.msk [vmem:[%s2457_s29 + $0x18] sm:$0xff] %vm1139_vm6, %v1126_v16 }
 0x292   : > { %1141 = vst.msk [vmem:[%s2457_s29 + $0x8] sm:$0xff] %vm1139_vm6, %v1124_v7  ;;  %v1161_v7 = vld [vmem:[%s2462_s18 + $0x28] sm:$0xff] }
 0x293   : > { %1145 = vst.msk [vmem:[%s2457_s29 + $0x28] sm:$0xff] %vm1139_vm6, %v1128_v39  ;;  %v1163_v39 = vld [vmem:[%s2462_s18 + $0x38] sm:$0xff] }
 0x296   : > { %v1106_v46 = vpop.xlane.xlu1 %1105 }
 0x297   : > { %v1104_v11 = vpop.xlane.xlu0 %1103  ;;  %v1130_v43 = vmax.f32 %v1082_v33, %v1106_v46  ;;  %v1108_v47 = vpop.xlane.xlu2 %1107 }
 0x298   : > { %v1129_v61 = vmax.f32 %v1081_v9, %v1104_v11  ;;  %v1131_v53 = vmax.f32 %v1083_v32, %v1108_v47  ;;  %v1165_v47 = vld [vmem:[%s2462_s18 + $0x48] sm:$0xff] }
 0x299   : > { %1147 = vst.msk [vmem:[%s2457_s29 + $0x38] sm:$0xff] %vm1139_vm6, %v1130_v43 }
 0x29a   : > { %1146 = vst.msk [vmem:[%s2457_s29 + $0x30] sm:$0xff] %vm1139_vm6, %v1129_v61  ;;  %v1164_v61 = vld [vmem:[%s2462_s18 + $0x40] sm:$0xff] }
 0x29b   : > { %1148 = vst.msk [vmem:[%s2457_s29 + $0x40] sm:$0xff] %vm1139_vm6, %v1131_v53  ;;  %v1166_v53 = vld [vmem:[%s2462_s18 + $0x50] sm:$0xff] }
 0x29e   : > { %v1112_v1 = vpop.xlane.xlu1 %1111 }
 0x29f   : > { %v1110_v60 = vpop.xlane.xlu0 %1109  ;;  %v1133_v52 = vmax.f32 %v1085_v12, %v1112_v1  ;;  %v1114_v59 = vpop.xlane.xlu2 %1113 }
 0x2a0   : > { %v1132_v2 = vmax.f32 %v1084_v56, %v1110_v60  ;;  %v1134_v45 = vmax.f32 %v1086_v44, %v1114_v59  ;;  %v1168_v59 = vld [vmem:[%s2462_s18 + $0x60] sm:$0xff] }
 0x2a1   : > { %1150 = vst.msk [vmem:[%s2457_s29 + $0x50] sm:$0xff] %vm1139_vm6, %v1133_v52 }
 0x2a2   : > { %1149 = vst.msk [vmem:[%s2457_s29 + $0x48] sm:$0xff] %vm1139_vm6, %v1132_v2  ;;  %v1167_v2 = vld [vmem:[%s2462_s18 + $0x58] sm:$0xff] }
 0x2a3   : > { %1151 = vst.msk [vmem:[%s2457_s29 + $0x58] sm:$0xff] %vm1139_vm6, %v1134_v45  ;;  %v1169_v45 = vld [vmem:[%s2462_s18 + $0x68] sm:$0xff] }
 0x2a6   : > { %v1118_v20 = vpop.xlane.xlu1 %1117 }
 0x2a7   : > { %v1116_v22 = vpop.xlane.xlu0 %1115  ;;  %v1136_v24 = vmax.f32 %v1088_v17, %v1118_v20  ;;  %v1120_v25 = vpop.xlane.xlu2 %1119 }
 0x2a8   : > { %v1135_v23 = vmax.f32 %v1087_v19, %v1116_v22  ;;  %v1137_v31 = vmax.f32 %v1089_v21, %v1120_v25  ;;  %v1171_v25 = vld [vmem:[%s2462_s18 + $0x78] sm:$0xff] }
 0x2a9   : > { %1153 = vst.msk [vmem:[%s2457_s29 + $0x68] sm:$0xff] %vm1139_vm6, %v1136_v24 }
 0x2aa   : > { %1152 = vst.msk [vmem:[%s2457_s29 + $0x60] sm:$0xff] %vm1139_vm6, %v1135_v23  ;;  %v1170_v23 = vld [vmem:[%s2462_s18 + $0x70] sm:$0xff] }
 0x2ab   : > { %1154 = vst.msk [vmem:[%s2457_s29 + $0x70] sm:$0xff] %vm1139_vm6, %v1137_v31 }
 0x2ae   : > { %v1205_v49 = vpop.xlane.xlu1 %1204 }
 0x2af   : > { %v1122_v35 = vpop.xlane.xlu0 %1121  ;;  %v1236_v10 = vadd.f32 %v1205_v49, %v1156_v34  ;;  %v1207_v29 = vpop.xlane.xlu2 %1206 }
 0x2b0   : > { %v1138_v8 = vmax.f32 %v1090_v26, %v1122_v35  ;;  %v1237_v30 = vadd.f32 %v1207_v29, %v1157_v48 }
 0x2b1   : > { %1252 = vst.msk [vmem:[%s2462_s18] sm:$0xff] %vm1139_vm6, %v1236_v10 }
 0x2b2   : > { %1155 = vst.msk [vmem:[%s2457_s29 + $0x78] sm:$0xff] %vm1139_vm6, %v1138_v8 }
 0x2b3   : > { %1253 = vst.msk [vmem:[%s2462_s18 + $0x8] sm:$0xff] %vm1139_vm6, %v1237_v30 }
 0x2b6   : > { %v1211_v42 = vpop.xlane.xlu1 %1210 }
 0x2b7   : > { %v1209_v13 = vpop.xlane.xlu0 %1208  ;;  %v1239_v18 = vadd.f32 %v1211_v42, %v1159_v58  ;;  %v1213_v5 = vpop.xlane.xlu2 %1212 }
 0x2b8   : > { %v1238_v57 = vadd.f32 %v1209_v13, %v1158_v62  ;;  %v1240_v16 = vadd.f32 %v1213_v5, %v1160_v14 }
 0x2b9   : > { %1255 = vst.msk [vmem:[%s2462_s18 + $0x18] sm:$0xff] %vm1139_vm6, %v1239_v18 }
 0x2ba   : > { %1254 = vst.msk [vmem:[%s2462_s18 + $0x10] sm:$0xff] %vm1139_vm6, %v1238_v57 }
 0x2bb   : > { %1256 = vst.msk [vmem:[%s2462_s18 + $0x20] sm:$0xff] %vm1139_vm6, %v1240_v16 }
 0x2be   : > { %v1217_v9 = vpop.xlane.xlu1 %1216 }
 0x2bf   : > { %v1215_v33 = vpop.xlane.xlu0 %1214  ;;  %v1242_v46 = vadd.f32 %v1217_v9, %v1162_v38  ;;  %v1219_v11 = vpop.xlane.xlu2 %1218 }
 0x2c0   : > { %v1241_v32 = vadd.f32 %v1215_v33, %v1161_v7  ;;  %v1243_v43 = vadd.f32 %v1219_v11, %v1163_v39 }
 0x2c1   : > { %1258 = vst.msk [vmem:[%s2462_s18 + $0x30] sm:$0xff] %vm1139_vm6, %v1242_v46 }
 0x2c2   : > { %1257 = vst.msk [vmem:[%s2462_s18 + $0x28] sm:$0xff] %vm1139_vm6, %v1241_v32 }
 0x2c3   : > { %1259 = vst.msk [vmem:[%s2462_s18 + $0x38] sm:$0xff] %vm1139_vm6, %v1243_v43 }
 0x2c6   : > { %v1223_v56 = vpop.xlane.xlu1 %1222 }
 0x2c7   : > { %v1221_v12 = vpop.xlane.xlu0 %1220  ;;  %v1245_v1 = vadd.f32 %v1223_v56, %v1165_v47  ;;  %v1225_v60 = vpop.xlane.xlu2 %1224 }
 0x2c8   : > { %v1244_v44 = vadd.f32 %v1221_v12, %v1164_v61  ;;  %v1246_v52 = vadd.f32 %v1225_v60, %v1166_v53 }
 0x2c9   : > { %1261 = vst.msk [vmem:[%s2462_s18 + $0x48] sm:$0xff] %vm1139_vm6, %v1245_v1 }
 0x2ca   : > { %1260 = vst.msk [vmem:[%s2462_s18 + $0x40] sm:$0xff] %vm1139_vm6, %v1244_v44 }
 0x2cb   : > { %1262 = vst.msk [vmem:[%s2462_s18 + $0x50] sm:$0xff] %vm1139_vm6, %v1246_v52 }
 0x2ce   : > { %v1229_v19 = vpop.xlane.xlu1 %1228 }
 0x2cf   : > { %v1227_v17 = vpop.xlane.xlu0 %1226  ;;  %v1248_v20 = vadd.f32 %v1229_v19, %v1168_v59  ;;  %v1231_v22 = vpop.xlane.xlu2 %1230 }
 0x2d0   : > { %v1247_v21 = vadd.f32 %v1227_v17, %v1167_v2  ;;  %v1249_v24 = vadd.f32 %v1231_v22, %v1169_v45 }
 0x2d1   : > { %1264 = vst.msk [vmem:[%s2462_s18 + $0x60] sm:$0xff] %vm1139_vm6, %v1248_v20 }
 0x2d2   : > { %1263 = vst.msk [vmem:[%s2462_s18 + $0x58] sm:$0xff] %vm1139_vm6, %v1247_v21 }
 0x2d3   : > { %1265 = vst.msk [vmem:[%s2462_s18 + $0x68] sm:$0xff] %vm1139_vm6, %v1249_v24 }
 0x2d6   : > { %v1235_v26 = vpop.xlane.xlu1 %1234 }
 0x2d7   : > { %v1233_v31 = vpop.xlane.xlu0 %1232  ;;  %v1251_v48 = vadd.f32 %v1235_v26, %v1171_v25 }
 0x2d8   : > { %v1250_v34 = vadd.f32 %v1233_v31, %v1170_v23 }
 0x2d9   : > { %1267 = vst.msk [vmem:[%s2462_s18 + $0x78] sm:$0xff] %vm1139_vm6, %v1251_v48 }
 0x2da   : > { %1266 = vst.msk [vmem:[%s2462_s18 + $0x70] sm:$0xff] %vm1139_vm6, %v1250_v34 }
 0x2db PF: > { %v1268_v35 = vld [vmem:[%s2452_s15] sm:$0x1] }
 0x2dc   : > { %v3327_v49 = vld [vmem:[%s2452_s15] ss:$0 sm:$0xff]  ;;  %v1879_v8 = vadd.f32 -0.2, %v1268_v35 }
 0x2dd   : > { %vm3816_vm10 = vcmp.lt.f32.partialorder %v2693_v27, %v3327_v49  ;;  %vm3815_vm11 = vcmp.lt.f32.partialorder %v2723_v40, %v3327_v49  ;;  %vm3819_vm2 = vcmp.lt.f32.partialorder %v2755_v54, %v3327_v49 }
 0x2de   : > { %v1271_v10 = vperm.slane %v1879_v8, 0 }
 0x2e0   : > { %v1273_v29 = vsub.f32 %v2693_v27, %v1271_v10  ;;  %v1274_v30 = vsub.f32 %v2723_v40, %v1271_v10  ;;  %v1275_v62 = vsub.f32 %v2755_v54, %v1271_v10  ;;  %v1276_v58 = vsub.f32 %v2788_v3, %v1271_v10 }
 0x2e1   : > { %v1277_v14 = vsub.f32 %v2695_v28, %v1271_v10  ;;  %v1278_v13 = vsub.f32 %v2725_v41, %v1271_v10  ;;  %v1279_v42 = vsub.f32 %v2757_v55, %v1271_v10  ;;  %v1280_v57 = vsub.f32 %v2790_v4, %v1271_v10 }
 0x2e2   : > { %v1281_v18 = vsub.f32 %v2713_v36, %v1271_v10  ;;  %v1282_v5 = vsub.f32 %v2745_v50, %v1271_v10  ;;  %v1283_v16 = vsub.f32 %v2776_v63, %v1271_v10  ;;  %v1284_v7 = vsub.f32 %v2810_v6, %v1271_v10 }
 0x2e3   : > { %v1285_v38 = vsub.f32 %v2715_v37, %v1271_v10  ;;  %v1286_v39 = vsub.f32 %v2747_v51, %v1271_v10  ;;  %v1287_v33 = vsub.f32 %v2778_v0, %v1271_v10  ;;  %v1288_v9 = vsub.f32 %v2812_v15, %v1271_v10 }
 0x2e4   : > { %v3367_v32 = vmax.f32 %v1273_v29, 0.0  ;;  %v3369_v46 = vmax.f32 %v1274_v30, 0.0  ;;  %v3371_v11 = vmax.f32 %v1275_v62, 0.0  ;;  %v3373_v43 = vmax.f32 %v1276_v58, 0.0 }
 0x2e5   : > { %v3375_v61 = vmax.f32 %v1277_v14, 0.0  ;;  %v3377_v47 = vmax.f32 %v1278_v13, 0.0  ;;  %v3379_v53 = vmax.f32 %v1279_v42, 0.0  ;;  %v3381_v12 = vmax.f32 %v1280_v57, 0.0 }
 0x2e6   : > { %v3383_v56 = vmax.f32 %v1281_v18, 0.0  ;;  %v3385_v44 = vmax.f32 %v1282_v5, 0.0  ;;  %v3387_v1 = vmax.f32 %v1283_v16, 0.0  ;;  %v3389_v60 = vmax.f32 %v1284_v7, 0.0 }
 0x2e7   : > { %v3391_v52 = vmax.f32 %v1285_v38, 0.0  ;;  %v3393_v2 = vmax.f32 %v1286_v39, 0.0  ;;  %v3395_v59 = vmax.f32 %v1287_v33, 0.0  ;;  %v3397_v45 = vmax.f32 %v1288_v9, 0.0  ;;  %1325 = sbr.rel (%p2657_p12) target bundleno = 816 (0x330), region = 56 }
 0x2e8   : > { %3888 = vst [vmem:[#allocation22_spill] sm:$0xff] %v3385_v44 }
 0x2e9   : > { %3889 = vst [vmem:[#allocation23_spill] sm:$0xff] %v3387_v1 }
 0x2ea   : > { %3890 = vst [vmem:[#allocation31_spill] sm:$0xff] %v3389_v60 }
 0x2eb   : > { %3891 = vst [vmem:[#allocation26_spill] sm:$0xff] %v3397_v45 }
 0x2ec   : > { %v1326_v17 = vlaneseq  ;;  %v1343_v21 = vstv %s2648_s1  ;;  %v1362_v22 = vstv %s2651_s28 }
 0x2ee   : > { %v1327_v19 = vshrl.u32 %v1326_v17, 7  ;;  %v1361_v20 = vand.u32 127, %v1326_v17 }
 0x2f0   : > { %v1328_v24 = vadd.s32 8, %v1327_v19  ;;  %v1329_v23 = vadd.s32 16, %v1327_v19  ;;  %v1330_v25 = vadd.s32 24, %v1327_v19  ;;  %v1331_v31 = vadd.s32 32, %v1327_v19 }
 0x2f1   : > { %v1332_v26 = vadd.s32 40, %v1327_v19  ;;  %v1333_v34 = vadd.s32 48, %v1327_v19  ;;  %v1334_v48 = vadd.s32 56, %v1327_v19  ;;  %v1335_v35 = vadd.s32 64, %v1327_v19 }
 0x2f2   : > { %v1336_v8 = vadd.s32 72, %v1327_v19  ;;  %v1337_v10 = vadd.s32 80, %v1327_v19  ;;  %v1338_v29 = vadd.s32 88, %v1327_v19  ;;  %v1339_v30 = vadd.s32 96, %v1327_v19 }
 0x2f3   : > { %v1340_v62 = vadd.s32 104, %v1327_v19  ;;  %v1341_v58 = vadd.s32 112, %v1327_v19  ;;  %v1342_v14 = vadd.s32 120, %v1327_v19  ;;  %v1344_v13 = vadd.s32 %v1343_v21, %v1327_v19 }
 0x2f4   : > { %v1345_v42 = vadd.s32 %v1343_v21, %v1328_v24  ;;  %v1346_v57 = vadd.s32 %v1343_v21, %v1329_v23  ;;  %v1347_v18 = vadd.s32 %v1343_v21, %v1330_v25  ;;  %v3413_v5 = vadd.s32 %v1343_v21, %v1331_v31 }
 0x2f5   : > { %v3415_v16 = vadd.s32 %v1343_v21, %v1332_v26  ;;  %v3417_v7 = vadd.s32 %v1343_v21, %v1333_v34  ;;  %v3419_v38 = vadd.s32 %v1343_v21, %v1334_v48  ;;  %v3421_v39 = vadd.s32 %v1362_v22, %v1361_v20 }
 0x2f6   : > { %v3423_v33 = vadd.s32 %v1343_v21, %v1335_v35  ;;  %v3425_v9 = vadd.s32 %v1343_v21, %v1336_v8  ;;  %v3427_v17 = vadd.s32 %v1343_v21, %v1337_v10  ;;  %v3429_v19 = vadd.s32 %v1343_v21, %v1338_v29 }
 0x2f7   : > { %v3431_v24 = vadd.s32 %v1343_v21, %v1339_v30  ;;  %v3433_v23 = vadd.s32 %v1343_v21, %v1340_v62  ;;  %v3435_v25 = vadd.s32 %v1343_v21, %v1341_v58  ;;  %v3437_v31 = vadd.s32 %v1343_v21, %v1342_v14 }
 0x2f8   : > { %vm1364_vm6 = vcmp.ne.s32.totalorder %v1344_v13, %v3421_v39  ;;  %vm1365_vm4 = vcmp.ne.s32.totalorder %v1345_v42, %v3421_v39  ;;  %vm1366_vm8 = vcmp.ne.s32.totalorder %v1346_v57, %v3421_v39  ;;  %vm3806_vm0 = vcmp.ne.s32.totalorder %v1347_v18, %v3421_v39 }
 0x2f9   : > { %vm3805_vm14 = vcmp.ne.s32.totalorder %v3413_v5, %v3421_v39  ;;  %vm3807_vm12 = vcmp.ne.s32.totalorder %v3415_v16, %v3421_v39  ;;  %vm1370_vm15 = vcmp.ne.s32.totalorder %v3417_v7, %v3421_v39  ;;  %vm1371_vm13 = vcmp.ne.s32.totalorder %v3419_v38, %v3421_v39 }
 0x2fa   : > { %vm3808_vm9 = vcmp.ne.s32.totalorder %v3423_v33, %v3421_v39  ;;  %vm1373_vm7 = vcmp.ne.s32.totalorder %v3425_v9, %v3421_v39  ;;  %vm3809_vm5 = vcmp.ne.s32.totalorder %v3427_v17, %v3421_v39  ;;  %vm1375_vm1 = vcmp.ne.s32.totalorder %v3429_v19, %v3421_v39 }
 0x2fb   : > { %v1380_v21 = vsel %vm1364_vm6, %v3367_v32, 0.0  ;;  %v1381_v20 = vsel %vm1365_vm4, %v3369_v46, 0.0  ;;  %v1382_v22 = vsel %vm1366_vm8, %v3371_v11, 0.0  ;;  %v1383_v26 = vsel %vm3806_vm0, %v3373_v43, 0.0 }
 0x2fc   : > { %v1384_v34 = vsel %vm3805_vm14, %v3375_v61, 0.0  ;;  %v1385_v48 = vsel %vm3807_vm12, %v3377_v47, 0.0  ;;  %v1386_v35 = vsel %vm1370_vm15, %v3379_v53, 0.0  ;;  %v1387_v8 = vsel %vm1371_vm13, %v3381_v12, 0.0 }
 0x2fd   : > { %vm1376_vm3 = vcmp.ne.s32.totalorder %v3431_v24, %v3421_v39  ;;  %vm1377_vm14 = vcmp.ne.s32.totalorder %v3433_v23, %v3421_v39  ;;  %vm1378_vm0 = vcmp.ne.s32.totalorder %v3435_v25, %v3421_v39  ;;  %vm1379_vm12 = vcmp.ne.s32.totalorder %v3437_v31, %v3421_v39 }
 0x2fe   : > { %v1388_v10 = vsel %vm3808_vm9, %v3383_v56, 0.0  ;;  %v1389_v29 = vsel %vm1373_vm7, %v3385_v44, 0.0  ;;  %v1390_v30 = vsel %vm3809_vm5, %v3387_v1, 0.0  ;;  %v1391_v62 = vsel %vm1375_vm1, %v3389_v60, 0.0  ;;  %vm3516_vm9 = vmand %vm3816_vm10, %vm1364_vm6 }
 0x2ff   : > { %vm3525_vm5 = vmand %vm3815_vm11, %vm1365_vm4  ;;  %v1412_v1 = vmax.f32 %v1380_v21, %v1384_v34  ;;  %v1413_v60 = vmax.f32 %v1381_v20, %v1385_v48  ;;  %v1414_v44 = vmax.f32 %v1382_v22, %v1386_v35  ;;  %v1415_v13 = vmax.f32 %v1383_v26, %v1387_v8 }
 0x300   : > { %v1392_v27 = vsel %vm1376_vm3, %v3391_v52, 0.0  ;;  %v1393_v42 = vsel %vm1377_vm14, %v3393_v2, 0.0  ;;  %v1394_v40 = vsel %vm1378_vm0, %v3395_v59, 0.0  ;;  %v1395_v21 = vsel %vm1379_vm12, %v3397_v45, 0.0  ;;  %vm1398_vm4 = vmand %vm3819_vm2, %vm1366_vm8 }
 0x301   : > { %v1416_v20 = vmax.f32 %v1412_v1, %v1388_v10  ;;  %v1417_v22 = vmax.f32 %v1413_v60, %v1389_v29  ;;  %v1418_v26 = vmax.f32 %v1414_v44, %v1390_v30  ;;  %v1419_v34 = vmax.f32 %v1415_v13, %v1391_v62 }
 0x302   : > { %v2276_v48 = vmov 0.0   ;;  %vm3896_vm6 = vcmp.ne.s32.totalorder %v1347_v18, %v3421_v39  ;;  %vm3897_vm11 = vcmp.lt.f32.partialorder %v2788_v3, %v3327_v49  ;;  %vm3898_vm8 = vcmp.ne.s32.totalorder %v3413_v5, %v3421_v39 }
 0x303   : > { %v1880_v35 = vsel %vm3516_vm9, 1.0, %v2276_v48  ;;  %v1881_v8 = vsel %vm3525_vm5, 1.0, %v2276_v48  ;;  %vm1399_vm10 = vmand %vm3897_vm11, %vm3896_vm6  ;;  %v1420_v57 = vmax.f32 %v1416_v20, %v1392_v27  ;;  %v1421_v54 = vmax.f32 %v1417_v22, %v1393_v42 }
 0x304   : > { %v1422_v45 = vmax.f32 %v1418_v26, %v1394_v40  ;;  %v1423_v1 = vmax.f32 %v1419_v34, %v1395_v21  ;;  %v1882_v60 = vsel %vm1398_vm4, 1.0, %v2276_v48  ;;  %vm3899_vm9 = vcmp.lt.f32.partialorder %v2695_v28, %v3327_v49 }
 0x305   : > { %vm1400_vm2 = vmand %vm3899_vm9, %vm3898_vm8  ;;  %v1424_v44 = vmax.f32 %v1420_v57, %v1421_v54  ;;  %v1466_v29 = vadd.f32 %v1881_v8, %v1880_v35  ;;  %v1883_v18 = vsel %vm1399_vm10, 1.0, %v2276_v48  ;;  %vm3900_vm5 = vcmp.ne.s32.totalorder %v3415_v16, %v3421_v39 }
 0x306   : > { %v1425_v10 = vmax.f32 %v1422_v45, %v1423_v1  ;;  %vm3901_vm11 = vcmp.lt.f32.partialorder %v2725_v41, %v3327_v49  ;;  %v1884_v30 = vsel %vm1400_vm2, 1.0, %v2276_v48  ;;  %vm3902_vm4 = vcmp.lt.f32.partialorder %v2757_v55, %v3327_v49 }
 0x307   : > { %vm1401_vm6 = vmand %vm3901_vm11, %vm3900_vm5  ;;  %v1467_v40 = vadd.f32 %v1882_v60, %v1466_v29  ;;  %vm3903_vm10 = vcmp.lt.f32.partialorder %v2790_v4, %v3327_v49  ;;  %vm3904_vm2 = vcmp.ne.s32.totalorder %v3423_v33, %v3421_v39  ;;  %vm3905_vm5 = vcmp.lt.f32.partialorder %v2713_v36, %v3327_v49 }
 0x308   : > { %v1426_v27 = vmax.f32 %v1424_v44, %v1425_v10  ;;  %vm1402_vm8 = vmand %vm3902_vm4, %vm1370_vm15  ;;  %v1885_v5 = vsel %vm1401_vm6, 1.0, %v2276_v48  ;;  %vm3907_vm6 = vcmp.ne.s32.totalorder %v3427_v17, %v3421_v39  ;;  %vm3908_vm4 = vcmp.lt.f32.partialorder %v2776_v63, %v3327_v49 }
 0x309   : > { %v1468_v45 = vadd.f32 %v1883_v18, %v1467_v40  ;;  %vm1403_vm9 = vmand %vm3903_vm10, %vm1371_vm13  ;;  %v1886_v58 = vsel %vm1402_vm8, 1.0, %v2276_v48  ;;  %vm3906_vm13 = vcmp.lt.f32.partialorder %v2745_v50, %v3327_v49  ;;  %vm3909_vm10 = vcmp.lt.f32.partialorder %v2810_v6, %v3327_v49 }
 0x30a   : > { %v1427_v54 = vrot.slane %v1426_v27, 4  ;;  %vm1404_vm15 = vmand %vm3905_vm5, %vm3904_vm2  ;;  %v1887_v13 = vsel %vm1403_vm9, 1.0, %v2276_v48  ;;  %vm3910_vm9 = vcmp.lt.f32.partialorder %v2715_v37, %v3327_v49  ;;  %vm3911_vm5 = vcmp.lt.f32.partialorder %v2747_v51, %v3327_v49 }
 0x30b   : > { %v1469_v62 = vadd.f32 %v1884_v30, %v1468_v45  ;;  %vm1405_vm11 = vmand %vm3906_vm13, %vm1373_vm7  ;;  %v1888_v21 = vsel %vm1404_vm15, 1.0, %v2276_v48  ;;  %vm3912_vm15 = vcmp.lt.f32.partialorder %v2778_v0, %v3327_v49 }
 0x30c   : > { %v1428_v16 = vmax.f32 %v1426_v27, %v1427_v54  ;;  %vm1406_vm8 = vmand %vm3908_vm4, %vm3907_vm6  ;;  %v1889_v22 = vsel %vm1405_vm11, 1.0, %v2276_v48 }
 0x30d   : > { %v1470_v14 = vadd.f32 %v1885_v5, %v1469_v62  ;;  %vm1407_vm7 = vmand %vm3909_vm10, %vm1375_vm1  ;;  %v1890_v34 = vsel %vm1406_vm8, 1.0, %v2276_v48 }
 0x30e   : > { %v1429_v7 = vrot.slane %v1428_v16, 2  ;;  %vm1408_vm2 = vmand %vm3910_vm9, %vm1376_vm3  ;;  %v1891_v35 = vsel %vm1407_vm7, 1.0, %v2276_v48  ;;  %vm3913_vm3 = vcmp.lt.f32.partialorder %v2812_v15, %v3327_v49 }
 0x30f   : > { %v1471_v42 = vadd.f32 %v1886_v58, %v1470_v14  ;;  %vm1409_vm1 = vmand %vm3911_vm5, %vm1377_vm14  ;;  %v1892_v8 = vsel %vm1408_vm2, 1.0, %v2276_v48 }
 0x310   : > { %v1430_v38 = vmax.f32 %v1428_v16, %v1429_v7  ;;  %vm1410_vm13 = vmand %vm3912_vm15, %vm1378_vm0  ;;  %v1893_v57 = vsel %vm1409_vm1, 1.0, %v2276_v48 }
 0x311   : > { %v1472_v20 = vadd.f32 %v1887_v13, %v1471_v42  ;;  %vm1411_vm11 = vmand %vm3913_vm3, %vm1379_vm12  ;;  %v1894_v1 = vsel %vm1410_vm13, 1.0, %v2276_v48 }
 0x312   : > { %v1431_v33 = vrot.slane %v1430_v38, 1  ;;  %v1895_v44 = vsel %vm1411_vm11, 1.0, %v2276_v48 }
 0x313   : > { %v1473_v26 = vadd.f32 %v1888_v21, %v1472_v20 }
 0x314   : > { %v1432_v9 = vmax.f32 %v1430_v38, %v1431_v33 }
 0x315   : > { %v1474_v17 = vadd.f32 %v1889_v22, %v1473_v26 }
 0x316   : > { %1433 = vst [vmem:[%s2465_s19] sm:$0x1] %v1432_v9 }
 0x317   : > { %v1475_v19 = vadd.f32 %v1890_v34, %v1474_v17 }
 0x319   : > { %v1476_v24 = vadd.f32 %v1891_v35, %v1475_v19 }
 0x31b   : > { %v1477_v23 = vadd.f32 %v1892_v8, %v1476_v24 }
 0x31d   : > { %v1478_v60 = vadd.f32 %v1893_v57, %v1477_v23 }
 0x31f   : > { %v1479_v10 = vadd.f32 %v1894_v1, %v1478_v60 }
 0x321   : > { %v1480_v25 = vadd.f32 %v1895_v44, %v1479_v10 }
 0x323   : > { %v1481_v29 = vrot.slane %v1480_v25, 4 }
 0x325   : > { %v1482_v18 = vadd.f32 %v1481_v29, %v1480_v25 }
 0x327   : > { %v1483_v27 = vrot.slane %v1482_v18, 2 }
 0x329   : > { %v1484_v40 = vadd.f32 %v1483_v27, %v1482_v18 }
 0x32b   : > { %v1485_v30 = vrot.slane %v1484_v40, 1 }
 0x32d   : > { %v1486_v54 = vadd.f32 %v1485_v30, %v1484_v40 }
 0x32f   : > { %1487 = vst [vmem:[%s2468_s20] sm:$0x1] %v1486_v54 }
 0x330 PF: > { %1490 = sbr.rel (!%p2657_p12) target bundleno = 863 (0x35f), region = 60  ;;  %v1491_v39 = vmax.f32 (%p2657_p12), %v3367_v32, %v3375_v61  ;;  %v1492_v31 = vmax.f32 (%p2657_p12), %v3369_v46, %v3377_v47  ;;  %v1493_v48 = vmax.f32 (%p2657_p12), %v3371_v11, %v3379_v53  ;;  %v1494_v45 = vmax.f32 (%p2657_p12), %v3373_v43, %v3381_v12  ;;  %v3918_v53 = vld [vmem:[#allocation21_spill] sm:$0xff] (%p2657_p12)  ;;  %v3920_v12 = vld [vmem:[#allocation24_spill] sm:$0xff] (%p2657_p12) }
 0x331   : > { %v2277_v11 = vmov (%p2657_p12), 0.0   ;;  %vm3919_vm12 = vcmp.lt.f32.partialorder (%p2657_p12), %v3918_v53, %v3327_v49  ;;  %vm3921_vm14 = vcmp.lt.f32.partialorder (%p2657_p12), %v3920_v12, %v3327_v49  ;;  %v3922_v33 = vld [vmem:[#allocation28_spill] sm:$0xff] (%p2657_p12)  ;;  %vm3924_vm6 = vcmp.lt.f32.partialorder (%p2657_p12), %v2788_v3, %v3327_v49 }
 0x332   : > { %v1495_v5 = vmax.f32 (%p2657_p12), %v1491_v39, %v3383_v56  ;;  %v1896_v43 = vsel (%p2657_p12), %vm3919_vm12, 1.0, %v2277_v11  ;;  %v1897_v56 = vsel (%p2657_p12), %vm3921_vm14, 1.0, %v2277_v11  ;;  %vm3923_vm0 = vcmp.lt.f32.partialorder (%p2657_p12), %v3922_v33, %v3327_v49 }
 0x333   : > { %v3914_v16 = vld [vmem:[#allocation22_spill] sm:$0xff] (%p2657_p12)  ;;  %v1545_v20 = vadd.f32 (%p2657_p12), %v1897_v56, %v1896_v43  ;;  %vm3925_vm4 = vcmp.lt.f32.partialorder (%p2657_p12), %v2695_v28, %v3327_v49  ;;  %vm3926_vm8 = vcmp.lt.f32.partialorder (%p2657_p12), %v2725_v41, %v3327_v49  ;;  %vm3927_vm10 = vcmp.lt.f32.partialorder (%p2657_p12), %v2757_v55, %v3327_v49 }
 0x334   : > { %v1496_v62 = vmax.f32 (%p2657_p12), %v1492_v31, %v3914_v16  ;;  %v3915_v58 = vld [vmem:[#allocation23_spill] sm:$0xff] (%p2657_p12)  ;;  %v1499_v38 = vmax.f32 (%p2657_p12), %v1495_v5, %v3391_v52  ;;  %v1898_v52 = vsel (%p2657_p12), %vm3923_vm0, 1.0, %v2277_v11  ;;  %v1900_v26 = vsel (%p2657_p12), %vm3925_vm4, 1.0, %v2277_v11 }
 0x335   : > { %v1497_v7 = vmax.f32 %v1493_v48, %v3915_v58  ;;  %v3916_v14 = vld [vmem:[#allocation31_spill] sm:$0xff]  ;;  %v1546_v9 = vadd.f32 %v1898_v52, %v1545_v20  ;;  %v1901_v35 = vsel %vm3926_vm8, 1.0, %v2277_v11  ;;  %v1902_v3 = vsel %vm3927_vm10, 1.0, %v2277_v11 }
 0x336   : > { %v1498_v13 = vmax.f32 %v1494_v45, %v3916_v14  ;;  %v1500_v32 = vmax.f32 %v1496_v62, %v3393_v2  ;;  %v3917_v61 = vld [vmem:[#allocation26_spill] sm:$0xff]  ;;  %vm3928_vm7 = vcmp.lt.f32.partialorder %v2790_v4, %v3327_v49  ;;  %vm3929_vm9 = vcmp.lt.f32.partialorder %v2713_v36, %v3327_v49 }
 0x337   : > { %v1501_v46 = vmax.f32 %v1497_v7, %v3395_v59  ;;  %v1899_v59 = vsel %vm3924_vm6, 1.0, %v2277_v11  ;;  %v1903_v28 = vsel %vm3928_vm7, 1.0, %v2277_v11  ;;  %v1904_v60 = vsel %vm3929_vm9, 1.0, %v2277_v11 }
 0x338   : > { %v1502_v47 = vmax.f32 %v1498_v13, %v3917_v61  ;;  %v1503_v42 = vmax.f32 %v1499_v38, %v1500_v32  ;;  %v1547_v17 = vadd.f32 %v1899_v59, %v1546_v9  ;;  %vm3930_vm2 = vcmp.lt.f32.partialorder %v2745_v50, %v3327_v49 }
 0x339   : > { %v1905_v10 = vsel %vm3930_vm2, 1.0, %v2277_v11  ;;  %vm3931_vm5 = vcmp.lt.f32.partialorder %v2776_v63, %v3327_v49  ;;  %vm3932_vm1 = vcmp.lt.f32.partialorder %v2810_v6, %v3327_v49  ;;  %vm3933_vm15 = vcmp.lt.f32.partialorder %v2715_v37, %v3327_v49 }
 0x33a   : > { %v1504_v21 = vmax.f32 %v1501_v46, %v1502_v47  ;;  %v1548_v8 = vadd.f32 %v1900_v26, %v1547_v17  ;;  %v1906_v25 = vsel %vm3931_vm5, 1.0, %v2277_v11  ;;  %v1907_v29 = vsel %vm3932_vm1, 1.0, %v2277_v11 }
 0x33b   : > { %v1908_v36 = vsel %vm3933_vm15, 1.0, %v2277_v11  ;;  %vm3934_vm13 = vcmp.lt.f32.partialorder %v2747_v51, %v3327_v49  ;;  %vm3935_vm3 = vcmp.lt.f32.partialorder %v2778_v0, %v3327_v49  ;;  %vm3936_vm11 = vcmp.lt.f32.partialorder %v2812_v15, %v3327_v49 }
 0x33c   : > { %v1505_v2 = vmax.f32 %v1503_v42, %v1504_v21  ;;  %v1549_v57 = vadd.f32 %v1901_v35, %v1548_v8  ;;  %v1909_v50 = vsel %vm3934_vm13, 1.0, %v2277_v11  ;;  %v1910_v63 = vsel %vm3935_vm3, 1.0, %v2277_v11 }
 0x33d   : > { %v1911_v6 = vsel %vm3936_vm11, 1.0, %v2277_v11 }
 0x33e   : > { %v1506_v22 = vrot.slane %v1505_v2, 4  ;;  %v1550_v1 = vadd.f32 %v1902_v3, %v1549_v57 }
 0x340   : > { %v1507_v34 = vmax.f32 %v1505_v2, %v1506_v22  ;;  %v1551_v44 = vadd.f32 %v1903_v28, %v1550_v1 }
 0x342   : > { %v1508_v19 = vrot.slane %v1507_v34, 2  ;;  %v1552_v55 = vadd.f32 %v1904_v60, %v1551_v44 }
 0x344   : > { %v1509_v24 = vmax.f32 %v1507_v34, %v1508_v19  ;;  %v1553_v4 = vadd.f32 %v1905_v10, %v1552_v55 }
 0x346   : > { %v1510_v23 = vrot.slane %v1509_v24, 1  ;;  %v1554_v18 = vadd.f32 %v1906_v25, %v1553_v4 }
 0x348   : > { %v1511_v41 = vmax.f32 %v1509_v24, %v1510_v23  ;;  %v1555_v27 = vadd.f32 %v1907_v29, %v1554_v18 }
 0x34a   : > { %1512 = vst [vmem:[%s2465_s19] sm:$0x1] %v1511_v41  ;;  %v1556_v40 = vadd.f32 %v1908_v36, %v1555_v27 }
 0x34c   : > { %v1557_v30 = vadd.f32 %v1909_v50, %v1556_v40 }
 0x34e   : > { %v1558_v54 = vadd.f32 %v1910_v63, %v1557_v30 }
 0x350   : > { %v1559_v39 = vadd.f32 %v1911_v6, %v1558_v54 }
 0x352   : > { %v1560_v37 = vrot.slane %v1559_v39, 4 }
 0x354   : > { %v1561_v31 = vadd.f32 %v1560_v37, %v1559_v39 }
 0x356   : > { %v1562_v48 = vrot.slane %v1561_v31, 2 }
 0x358   : > { %v1563_v45 = vadd.f32 %v1562_v48, %v1561_v31 }
 0x35a   : > { %v1564_v5 = vrot.slane %v1563_v45, 1 }
 0x35c   : > { %v1565_v16 = vadd.f32 %v1564_v5, %v1563_v45 }
 0x35e   : > { %1566 = vst [vmem:[%s2468_s20] sm:$0x1] %v1565_v16 }
 0x35f PF: > { %s1912_s29 = sshll.u32 %s2256_s8, 1  ;;  %s1602_s17 = sshll.u32 %s2465_s19, 4  ;;  %s1603_s17 = int_to_ptr.vmem [resolvable:$true] %s1602_s17 }
 0x360   : > { %s1599_s27 = sadd.s32 %s2252_s30, %s1912_s29  ;;  %s1578_s1 = scalar_lea.sflag [#allocation4], %s2434_s24 }
 0x361   : > { %s1600_s13 = scalar_lea.hbm %s3776_s6, %s1599_s27  ;;  %s1615_s18 = scalar_lea.hbm %s3777_s7, %s1599_s27 }
 0x362   : > { %s1604_s15 = sshll.u32 %s1600_s13, 4  ;;  %s2134_s19 = scalar_lea.hbm %s3776_s6, 4  ;;  %s1605_s15 = int_to_ptr.hbm [resolvable:$true] %s1604_s15 }
 0x363   : > { %s2128_s28 = sshra.s32 %s1605_s15, 4  ;;  %s2129_s28 = int_to_ptr.hbm [resolvable:$true] %s2128_s28 }
 0x364   : > { %s2130_s21 = scalar_lea.hbm %s2129_s28, 1  ;;  %p2135_p5 = scmp.lt.s32.totalorder %s2129_s28, %s3776_s6 }
 0x365   : > { %p2131_p0 = scmp.ne.s32.totalorder %s2129_s28, %s2130_s21  ;;  %p2136_p6 = scmp.lt.s32.totalorder %s2134_s19, %s2130_s21 }
 0x367   : > { %p2132_p1 = pnand %p2131_p0, %p2408_p13  ;;  %p2137_p7 = por %p2136_p6, %p2135_p5 }
 0x369   : > { %p2133_p4 = pneg %p2132_p1 }
 0x36b   : > { %p2138_p3 = pnand %p2137_p7, %p2133_p4 }
 0x36d   : > { %2141 = shalt.err (!%p2138_p3)
}
 0x36e   : > { %1967 = dma.vmem_to_hbm [thread:$0]  (%p2408_p13), %s1603_s17, 16, %s1605_s15, %s1578_s1  }
 0x36f   : > { %s1617_s29 = sshll.u32 %s2468_s20, 4  ;;  %s1619_s27 = sshll.u32 %s1615_s18, 4  ;;  %s1618_s29 = int_to_ptr.vmem [resolvable:$true] %s1617_s29  ;;  %s1620_s27 = int_to_ptr.hbm [resolvable:$true] %s1619_s27 }
 0x370   : > { %s1582_s12 = scalar_lea.sflag [#allocation7], %s2434_s24  ;;  %s2156_s23 = sshra.s32 %s1620_s27, 4  ;;  %s2157_s23 = int_to_ptr.hbm [resolvable:$true] %s2156_s23 }
 0x371   : > { %s2158_s13 = scalar_lea.hbm %s2157_s23, 1  ;;  %s2162_s28 = scalar_lea.hbm %s3777_s7, 4 }
 0x372   : > { %p2159_p9 = scmp.ne.s32.totalorder %s2157_s23, %s2158_s13  ;;  %p2163_p11 = scmp.lt.s32.totalorder %s2157_s23, %s3777_s7 }
 0x373   : > { %p2164_p12 = scmp.lt.s32.totalorder %s2162_s28, %s2158_s13 }
 0x374   : > { %p2160_p8 = pnand %p2159_p9, %p2408_p13 }
 0x375   : > { %p2165_p0 = por %p2164_p12, %p2163_p11 }
 0x376   : > { %p2161_p10 = pneg %p2160_p8 }
 0x378   : > { %p2166_p1 = pnand %p2165_p0, %p2161_p10 }
 0x37a   : > { %2169 = shalt.err (!%p2166_p1)
}
 0x37b   : > { %1968 = dma.vmem_to_hbm [thread:$0]  (%p2408_p13), %s1618_s29, 16, %s1620_s27, %s1582_s12  }
 0x37c PF: > { %s3937_s24 = sld [smem:[#allocation11_spill]]  ;;  %p1983_p4 = scmp.ge.s32.totalorder %s2268_s11, 2 }
 0x37e   : > { %p1976_p5 = pnand %p1983_p4, %p2413_p2 }
 0x380   : > { %p1977_p6 = pneg %p1976_p5 }
 0x382   : > { %s1647_s20 = sand.u32 1, %s3937_s24  }
 0x383   : > { %s1648_s17 = scalar_lea.sflag [#allocation4], %s1647_s20 }
 0x384   : > { %2219 = dma.done.wait (%p1977_p6), %s1648_s17, 16  }
 0x385   : > { %2221 = vsyncadd (%p1977_p6), %s1648_s17, 4294967280  ;;  %s1657_s15 = scalar_lea.sflag [#allocation7], %s1647_s20 }
 0x386   : > { %2223 = dma.done.wait (%p1977_p6), %s1657_s15, 16  }
 0x387   : > { %2225 = vsyncadd (%p1977_p6), %s1657_s15, 4294967280  ;;  %s27_s11 = sadd.s32 1, %s2268_s11   ;;  %s3938_s14 = sld [smem:[#allocation12_spill]] }
 0x388   : > { %p24_p7 = scmp.ge.s32.totalorder %s27_s11, 6   ;;  %s3939_s26 = sld [smem:[#allocation20_spill]] }
 0x389   : > { %s3940_s27 = sld [smem:[#allocation13_spill]]  ;;  %s3947_s24 = smov %s2232_s25 }
 0x38a   : > { %s3941_s28 = sld [smem:[#allocation14_spill]] }
 0x38b   : > { %s3942_s29 = sld [smem:[#allocation19_spill]]  ;;  %26 = sbr.rel (!%p24_p7) target bundleno = 13 (0xd), region = 151 }
 0x38c   : > { %s3943_s30 = sld [smem:[#allocation15_spill]] }
 0x38d   : > { %s3944_s8 = sld [smem:[#allocation16_spill]]  ;;  %s3948_s25 = smov %s3938_s14 }
 0x38e   : > { %s3945_s9 = sld [smem:[#allocation17_spill]] }
 0x38f   : > { %s3946_s10 = sld [smem:[#allocation18_spill]] }
 0x390   :  { %1662 = vsyncpa [#allocation3], 1 }
 0x391   :  { %1664 = vsyncpa [#allocation3 + $0x1], 1 }
 0x392   :  { %1665 = vsyncpa [#allocation4], 1 }
 0x393   :  { %1667 = vsyncpa [#allocation4 + $0x1], 1 }
 0x394   :  { %1668 = vsyncpa [#allocation7], 1 }
 0x395   :  { %1670 = vsyncpa [#allocation7 + $0x1], 1 }

</bundles_post_ra>
